<compile_context>
chip_gen: v6e
topology: v6e:2x2x1
jax: 0.10.0
libtpu: 0.0.40
codegen_flags: <defaults>
</compile_context>

<pallas_src>
import functools

import numpy as np
import jax
import jax.numpy as jnp
from jax import lax
from jax.experimental import pallas as pl
from jax.experimental.pallas import tpu as pltpu

# top-k sizes hard-coded inside the PyTorch module
K_TOPK_SPATIAL_AVG = 169   # TopKSpatialPool2d(169)  (over channels)
K_TOPK_SPATIAL_MAX = 9     # TopKSpatialPool2d(9)    (over channels)
K_TOPK_CHANNEL = 225       # TopKChannelPool2d(225)  (over spatial)
BN_EPS = 1e-5


def _sigmoid(x):
    # 1/(1+exp(-x)) with both exp and the divide on the EUP slot.
    return pl.reciprocal(1.0 + jnp.exp(-x), approx=True)


def _topk_mean(x, k, axis):
    """Mean of the top-k largest entries along `axis` (keepdims)."""
    axis = axis % x.ndim
    n = x.shape[axis]
    if k >= n:
        # torch slicing [:k] / [-k:] keeps everything when k >= n -> plain mean
        return jnp.mean(x, axis=axis, keepdims=True)

    # TODO(synk): iterative max extraction bounded by lax.fori_loop (no k-times
    # trace unroll); exact for distinct values, ties are removed together
    # unlike torch.sort-based selection.
    red_shape = x.shape[:axis] + (1,) + x.shape[axis + 1:]

    def body(_, carry):
        acc, cur = carry
        m = jnp.max(cur, axis=axis, keepdims=True)
        return acc + m, jnp.where(cur == m, -jnp.inf, cur)

    acc, _ = lax.fori_loop(0, k, body, (jnp.zeros(red_shape, x.dtype), x))
    return acc / float(k)


def _res_att_kernel(x_ref, masks_ref, wc1_ref, wch_ref, wv_ref, wa1k_ref,
                    wa1x_ref, wa2_ref, cc_ref, ca_ref, out_ref, *, H, W, Bblk):
    f32 = jnp.float32
    bf16 = jnp.bfloat16
    HW = H * W

    # Hoisted loads (shared across the Bblk images of this grid step).
    masks = masks_ref[...]                      # (9, HW) 3x3-tap boundary masks
    wch = wch_ref[...]                          # (C, C)  excite @ squeeze
    wv = wv_ref[...]                            # (C, C)  bf16, BN scale folded
    wa1k = wa1k_ref[...]                        # (CA, C) bf16, BN scale folded
    wa1x = wa1x_ref[...]                        # (CA, C) bf16, BN scale folded
    wa2 = wa2_ref[...]                          # (C, CA) bf16, tap-mean folded
    svo = cc_ref[:, 0:1]                        # value-embed BN offset  (C, 1)
    ba2f = cc_ref[:, 1:2]                       # conv2 bias (tap mean)  (C, 1)
    sbns = cc_ref[:, 2:3]                       # outer BN scale         (C, 1)
    sbno = cc_ref[:, 3:4]                       # outer BN offset        (C, 1)
    sa1o = ca_ref[...]                          # attention BN offset    (CA, 1)

    for b in range(Bblk):
        x = x_ref[b]                            # (C, HW) float32
        x_bf = x.astype(bf16)

        # ---------- CoTsSE spatial attention: channel pools + 3x3 conv ----
        avg_out = _topk_mean(x, K_TOPK_SPATIAL_AVG, axis=0)   # (1, HW)
        max_out = _topk_mean(x, K_TOPK_SPATIAL_MAX, axis=0)   # (1, HW)

        # center tap: no roll, no mask
        q = wc1_ref[0, 4] * avg_out + wc1_ref[1, 4] * max_out
        for dy in (-1, 0, 1):
            for dx in (-1, 0, 1):
                if dy == 0 and dx == 0:
                    continue
                tap = (dy + 1) * 3 + (dx + 1)
                # scalar tap weights from SMEM; conv is linear so the two
                # input channels can be combined before the (XLU) roll.
                comb = (wc1_ref[0, tap] * avg_out +
                        wc1_ref[1, tap] * max_out)            # (1, HW)
                shift = (-(dy * W + dx)) % HW
                if shift:
                    comb = pltpu.roll(comb, shift=shift, axis=1)
                comb = comb * masks[tap:tap + 1, :]
                q = q + comb
        sig_q = _sigmoid(q)                                   # (1, HW)

        # ---------- newcSE channel attention (pool first, convs commute) --
        if K_TOPK_CHANNEL >= HW:
            pooled = jnp.mean(x, axis=1, keepdims=True)       # (C, 1)
        else:
            pooled = _topk_mean(x, K_TOPK_CHANNEL, axis=1)    # (C, 1)
        z = _sigmoid(jnp.dot(wch, pooled,
                             preferred_element_type=f32))     # (C, 1)

        k1 = x * sig_q + x * z                                # (C, HW)

        # ---------- value embedding: 1x1 conv + folded BN ----------------
        v = jnp.dot(wv, x_bf, preferred_element_type=f32) + svo        # (C, HW)

        # ---------- attention embedding over y = cat([k1, x]) ------------
        a1 = (jnp.dot(wa1k, k1.astype(bf16), preferred_element_type=f32) +
              jnp.dot(wa1x, x_bf, preferred_element_type=f32) + sa1o)  # (CA,HW)
        a1 = jnp.maximum(a1, 0.0)
        # second 1x1 conv (CA -> 9*C) with the mean over the 3x3 taps folded
        # into the weights/bias -> (C, CA) @ (CA, HW) + (C, 1)
        att = jnp.dot(wa2, a1.astype(bf16), preferred_element_type=f32) + ba2f

        # softmax over flattened spatial (lanes); divide on the EUP
        m = jnp.max(att, axis=1, keepdims=True)
        e = jnp.exp(att - m)
        soft = e * pl.reciprocal(jnp.sum(e, axis=1, keepdims=True), approx=True)
        k2 = soft * v

        cots = k1 + k2                                        # CoTsSE output

        # ---------- ResAttentionBlock tail: BN(gamma=0) + skip + ReLU -----
        out_ref[b] = jnp.maximum(cots * sbns + sbno + x, 0.0)


def _fold_bn(g, b, rm, rv):
    s = g / jnp.sqrt(rv + BN_EPS)
    o = b - rm * s
    return s.reshape(-1, 1), o.reshape(-1, 1)      # (N, 1) scale, (N, 1) offset


def _conv_boundary_masks(H, W):
    """(9, H*W) float masks: masks[tap, p] = 1 if source p+(dy,dx) in bounds."""
    rows = np.repeat(np.arange(H), W)
    cols = np.tile(np.arange(W), H)
    masks = np.zeros((9, H * W), np.float32)
    for dy in (-1, 0, 1):
        for dx in (-1, 0, 1):
            tap = (dy + 1) * 3 + (dx + 1)
            valid = ((rows + dy >= 0) & (rows + dy < H) &
                     (cols + dx >= 0) & (cols + dx < W))
            masks[tap] = valid.astype(np.float32)
    return jnp.asarray(masks)


def _pick_batch_block(bs, C, HW, *, cap=8, vmem_budget_bytes=12 * 1024 * 1024):
    """Largest divisor of bs (<= cap) whose rough live set fits the budget."""
    per_image = C * HW * 4 * 12      # ~12 live f32 (C, HW) tensors per image
    best = 1
    for cand in range(1, min(bs, cap) + 1):
        if bs % cand == 0 and cand * per_image <= vmem_budget_bytes:
            best = cand
    return best


def init_params(key, channels):
    C = channels
    C2 = C // 2
    CA = (2 * C) // 8
    KK = 9                                          # kernel_size**2 (3x3)
    ks = jax.random.split(key, 7)

    def nrm(k, shape, scale):
        return scale * jax.random.normal(k, shape, jnp.float32)

    params = dict(
        w_conv1=nrm(ks[0], (1, 2, 3, 3), 0.2),      # CoTsSE.conv1
        w_sq=nrm(ks[1], (C2, C), 0.3),              # newcSE.Conv_Squeeze (1x1)
        w_ex=nrm(ks[2], (C, C2), 0.3),              # newcSE.Conv_Excitation
        w_v=nrm(ks[3], (C, C), 0.2),                # value_embed conv (1x1)
        w_a1=nrm(ks[4], (CA, 2 * C), 0.2),          # attention_embed conv1
        w_a2=nrm(ks[5], (KK * C, CA), 0.3),         # attention_embed conv2
        b_a2=nrm(ks[6], (KK * C,), 0.1),
        # BatchNorms (PyTorch-default init, inference mode)
        bn_v=(jnp.ones(C), jnp.zeros(C), jnp.zeros(C), jnp.ones(C)),
        bn_a1=(jnp.ones(CA), jnp.zeros(CA), jnp.zeros(CA), jnp.ones(CA)),
        # ResAttentionBlock.bn: nn.init.constant_(weight, 0), constant_(bias, 0)
        bn_out=(jnp.zeros(C), jnp.zeros(C), jnp.zeros(C), jnp.ones(C)),
    )
    return params


def res_attention_block(x, params):
    bs, C, H, W = x.shape
    HW = H * W
    KK = 9
    x2 = x.reshape(bs, C, HW).astype(jnp.float32)

    # ---------------- parameter folding (plain-JAX glue) ----------------
    wc1 = params["w_conv1"].reshape(2, KK).astype(jnp.float32)   # tap=(dy+1)*3+(dx+1)
    # newcSE has no nonlinearity between squeeze and excitation -> fold them.
    w_ch = jnp.dot(params["w_ex"], params["w_sq"])               # (C, C)
    svs, svo = _fold_bn(*params["bn_v"])
    wv = (svs * params["w_v"]).astype(jnp.bfloat16)              # BN scale folded
    sa1s, sa1o = _fold_bn(*params["bn_a1"])
    wa1 = sa1s * params["w_a1"]                                  # BN scale folded
    wa1k = wa1[:, :C].astype(jnp.bfloat16)                       # acts on k1
    wa1x = wa1[:, C:].astype(jnp.bfloat16)                       # acts on x
    wa2f = params["w_a2"].reshape(C, KK, -1).mean(axis=1).astype(jnp.bfloat16)
    ba2f = params["b_a2"].reshape(C, KK, 1).mean(axis=1)         # (C, 1)
    sbns, sbno = _fold_bn(*params["bn_out"])
    const_c = jnp.concatenate([svo, ba2f, sbns, sbno], axis=1)   # (C, 4)
    const_a = sa1o                                               # (CA, 1)
    masks = _conv_boundary_masks(H, W)                           # (9, HW)

    bblk = _pick_batch_block(bs, C, HW)
    kernel = functools.partial(_res_att_kernel, H=H, W=W, Bblk=bblk)

    def full(a):
        return pl.BlockSpec(a.shape, lambda i, _nd=a.ndim: (0,) * _nd)

    out = pl.pallas_call(
        kernel,
        out_shape=jax.ShapeDtypeStruct((bs, C, HW), jnp.float32),
        grid_spec=pltpu.PrefetchScalarGridSpec(
            num_scalar_prefetch=0,
            grid=(bs // bblk,),
            in_specs=[
                pl.BlockSpec((bblk, C, HW), lambda i: (i, 0, 0)),   # x
                full(masks),                                        # tap masks
                pl.BlockSpec(memory_space=pltpu.MemorySpace.SMEM),  # wc1 scalars
                full(w_ch), full(wv), full(wa1k), full(wa1x), full(wa2f),
                full(const_c), full(const_a),
            ],
            out_specs=pl.BlockSpec((bblk, C, HW), lambda i: (i, 0, 0)),
        ),
        compiler_params=pltpu.CompilerParams(
            dimension_semantics=("parallel",),
            vmem_limit_bytes=48 * 1024 * 1024),
    )(x2, masks, wc1, w_ch, wv, wa1k, wa1x, wa2f, const_c, const_a)

    return out.reshape(bs, C, H, W)


if __name__ == "__main__":
    key = jax.random.PRNGKey(0)
    kx, kp = jax.random.split(key)

    bs, C, H, W = 2, 8, 8, 16          # small NCHW shapes (H*W = 128 lanes)
    x = jax.random.normal(kx, (bs, C, H, W), jnp.float32)
    params = init_params(kp, C)

    out = jax.block_until_ready(res_attention_block(x, params))

    # ResAttentionBlock initializes bn.weight = bn.bias = 0, so the whole block
    # reduces to relu(identity + 0) = relu(x); the kernel still executes the
    # full CoTsSE attention path (NaN/Inf there would corrupt the result).
    expected = jnp.maximum(x, 0.0)
    assert out.shape == x.shape and out.dtype == jnp.float32
    np.testing.assert_allclose(np.asarray(out), np.asarray(expected),
                               rtol=1e-5, atol=1e-5)
    print("KERNEL_OK")
</pallas_src>

<mosaic_0001>
module attributes {stable_mosaic.version = 11 : i64} {
  func.func @_res_att_kernel(%arg0: i32, %arg1: memref<2x8x128xf32, #tpu.memory_space<vmem>>, %arg2: memref<9x128xf32, #tpu.memory_space<vmem>>, %arg3: memref<2x9xf32, #tpu.memory_space<smem>>, %arg4: memref<8x8xf32, #tpu.memory_space<vmem>>, %arg5: memref<8x8xbf16, #tpu.memory_space<vmem>>, %arg6: memref<2x8xbf16, #tpu.memory_space<vmem>>, %arg7: memref<2x8xbf16, #tpu.memory_space<vmem>>, %arg8: memref<8x2xbf16, #tpu.memory_space<vmem>>, %arg9: memref<8x4xf32, #tpu.memory_space<vmem>>, %arg10: memref<2x1xf32, #tpu.memory_space<vmem>>, %arg11: memref<2x8x128xf32, #tpu.memory_space<vmem>>) attributes {dimension_semantics = [#tpu.dimension_semantics<parallel>], iteration_bounds = array<i64: 1>, scalar_prefetch = 0 : i64, scratch_operands = 0 : i64, tpu.core_type = #tpu.core_type<tc>, window_params = [{transform_indices = @transform_0, window_bounds = array<i64: 2, 8, 128>}, {pipeline_mode = #tpu.pipeline_mode<synchronous>, transform_indices = @transform_1, window_bounds = array<i64: 9, 128>}, {transform_indices = @transform_2, window_bounds = array<i64: 2, 9>}, {pipeline_mode = #tpu.pipeline_mode<synchronous>, transform_indices = @transform_3, window_bounds = array<i64: 8, 8>}, {pipeline_mode = #tpu.pipeline_mode<synchronous>, transform_indices = @transform_4, window_bounds = array<i64: 8, 8>}, {pipeline_mode = #tpu.pipeline_mode<synchronous>, transform_indices = @transform_5, window_bounds = array<i64: 2, 8>}, {pipeline_mode = #tpu.pipeline_mode<synchronous>, transform_indices = @transform_6, window_bounds = array<i64: 2, 8>}, {pipeline_mode = #tpu.pipeline_mode<synchronous>, transform_indices = @transform_7, window_bounds = array<i64: 8, 2>}, {pipeline_mode = #tpu.pipeline_mode<synchronous>, transform_indices = @transform_8, window_bounds = array<i64: 8, 4>}, {pipeline_mode = #tpu.pipeline_mode<synchronous>, transform_indices = @transform_9, window_bounds = array<i64: 2, 1>}, {transform_indices = @transform_10, window_bounds = array<i64: 2, 8, 128>}]} {
    %c0 = arith.constant 0 : index
    %c0_0 = arith.constant 0 : index
    %0 = vector.load %arg2[%c0, %c0_0] : memref<9x128xf32, #tpu.memory_space<vmem>>, vector<9x128xf32>
    %c0_1 = arith.constant 0 : index
    %c0_2 = arith.constant 0 : index
    %1 = vector.load %arg4[%c0_1, %c0_2] : memref<8x8xf32, #tpu.memory_space<vmem>>, vector<8x8xf32>
    %c0_3 = arith.constant 0 : index
    %c0_4 = arith.constant 0 : index
    %2 = vector.load %arg5[%c0_3, %c0_4] : memref<8x8xbf16, #tpu.memory_space<vmem>>, vector<8x8xbf16>
    %c0_5 = arith.constant 0 : index
    %c0_6 = arith.constant 0 : index
    %3 = vector.load %arg6[%c0_5, %c0_6] : memref<2x8xbf16, #tpu.memory_space<vmem>>, vector<2x8xbf16>
    %c0_7 = arith.constant 0 : index
    %c0_8 = arith.constant 0 : index
    %4 = vector.load %arg7[%c0_7, %c0_8] : memref<2x8xbf16, #tpu.memory_space<vmem>>, vector<2x8xbf16>
    %c0_9 = arith.constant 0 : index
    %c0_10 = arith.constant 0 : index
    %5 = vector.load %arg8[%c0_9, %c0_10] : memref<8x2xbf16, #tpu.memory_space<vmem>>, vector<8x2xbf16>
    %c0_11 = arith.constant 0 : index
    %c0_12 = arith.constant 0 : index
    %6 = vector.load %arg9[%c0_11, %c0_12] : memref<8x4xf32, #tpu.memory_space<vmem>>, vector<8x1xf32>
    %c0_13 = arith.constant 0 : index
    %c1 = arith.constant 1 : index
    %7 = vector.load %arg9[%c0_13, %c1] : memref<8x4xf32, #tpu.memory_space<vmem>>, vector<8x1xf32>
    %c0_14 = arith.constant 0 : index
    %c2 = arith.constant 2 : index
    %8 = vector.load %arg9[%c0_14, %c2] : memref<8x4xf32, #tpu.memory_space<vmem>>, vector<8x1xf32>
    %c0_15 = arith.constant 0 : index
    %c3 = arith.constant 3 : index
    %9 = vector.load %arg9[%c0_15, %c3] : memref<8x4xf32, #tpu.memory_space<vmem>>, vector<8x1xf32>
    %c0_16 = arith.constant 0 : index
    %c0_17 = arith.constant 0 : index
    %10 = vector.load %arg10[%c0_16, %c0_17] : memref<2x1xf32, #tpu.memory_space<vmem>>, vector<2x1xf32>
    %c0_18 = arith.constant 0 : index
    %c0_19 = arith.constant 0 : index
    %c0_20 = arith.constant 0 : index
    %11 = vector.load %arg1[%c0_18, %c0_19, %c0_20] : memref<2x8x128xf32, #tpu.memory_space<vmem>>, vector<1x8x128xf32>
    %12 = vector.shape_cast %11 : vector<1x8x128xf32> to vector<8x128xf32>
    %13 = arith.truncf %12 : vector<8x128xf32> to vector<8x128xbf16>
    %cst = arith.constant dense<0.000000e+00> : vector<128xf32>
    %14 = vector.multi_reduction <add>, %12, %cst [0] : vector<8x128xf32> to vector<128xf32>
    %15 = vector.shape_cast %14 : vector<128xf32> to vector<1x128xf32>
    %cst_21 = arith.constant 8.000000e+00 : f32
    %16 = vector.broadcast %cst_21 : f32 to vector<1x128xf32>
    %17 = arith.divf %15, %16 : vector<1x128xf32>
    %cst_22 = arith.constant dense<0.000000e+00> : vector<128xf32>
    %18 = vector.multi_reduction <add>, %12, %cst_22 [0] : vector<8x128xf32> to vector<128xf32>
    %19 = vector.shape_cast %18 : vector<128xf32> to vector<1x128xf32>
    %cst_23 = arith.constant 8.000000e+00 : f32
    %20 = vector.broadcast %cst_23 : f32 to vector<1x128xf32>
    %21 = arith.divf %19, %20 : vector<1x128xf32>
    %c0_24 = arith.constant 0 : index
    %c4 = arith.constant 4 : index
    %22 = memref.load %arg3[%c0_24, %c4] : memref<2x9xf32, #tpu.memory_space<smem>>
    %23 = vector.broadcast %22 : f32 to vector<1x128xf32>
    %24 = arith.mulf %23, %17 : vector<1x128xf32>
    %c1_25 = arith.constant 1 : index
    %c4_26 = arith.constant 4 : index
    %25 = memref.load %arg3[%c1_25, %c4_26] : memref<2x9xf32, #tpu.memory_space<smem>>
    %26 = vector.broadcast %25 : f32 to vector<1x128xf32>
    %27 = arith.mulf %26, %21 : vector<1x128xf32>
    %28 = arith.addf %24, %27 : vector<1x128xf32>
    %c0_27 = arith.constant 0 : index
    %c0_28 = arith.constant 0 : index
    %29 = memref.load %arg3[%c0_27, %c0_28] : memref<2x9xf32, #tpu.memory_space<smem>>
    %30 = vector.broadcast %29 : f32 to vector<1x128xf32>
    %31 = arith.mulf %30, %17 : vector<1x128xf32>
    %c1_29 = arith.constant 1 : index
    %c0_30 = arith.constant 0 : index
    %32 = memref.load %arg3[%c1_29, %c0_30] : memref<2x9xf32, #tpu.memory_space<smem>>
    %33 = vector.broadcast %32 : f32 to vector<1x128xf32>
    %34 = arith.mulf %33, %21 : vector<1x128xf32>
    %35 = arith.addf %31, %34 : vector<1x128xf32>
    %c17_i32 = arith.constant 17 : i32
    %36 = tpu.dynamic_rotate %35 by %c17_i32 dim 1 : vector<1x128xf32>, i32 -> vector<1x128xf32>
    %37 = vector.extract_strided_slice %0 {offsets = [0, 0], sizes = [1, 128], strides = [1, 1]} : vector<9x128xf32> to vector<1x128xf32>
    %38 = arith.mulf %36, %37 : vector<1x128xf32>
    %39 = arith.addf %28, %38 : vector<1x128xf32>
    %c0_31 = arith.constant 0 : index
    %c1_32 = arith.constant 1 : index
    %40 = memref.load %arg3[%c0_31, %c1_32] : memref<2x9xf32, #tpu.memory_space<smem>>
    %41 = vector.broadcast %40 : f32 to vector<1x128xf32>
    %42 = arith.mulf %41, %17 : vector<1x128xf32>
    %c1_33 = arith.constant 1 : index
    %c1_34 = arith.constant 1 : index
    %43 = memref.load %arg3[%c1_33, %c1_34] : memref<2x9xf32, #tpu.memory_space<smem>>
    %44 = vector.broadcast %43 : f32 to vector<1x128xf32>
    %45 = arith.mulf %44, %21 : vector<1x128xf32>
    %46 = arith.addf %42, %45 : vector<1x128xf32>
    %c16_i32 = arith.constant 16 : i32
    %47 = tpu.dynamic_rotate %46 by %c16_i32 dim 1 : vector<1x128xf32>, i32 -> vector<1x128xf32>
    %48 = vector.extract_strided_slice %0 {offsets = [1, 0], sizes = [1, 128], strides = [1, 1]} : vector<9x128xf32> to vector<1x128xf32>
    %49 = arith.mulf %47, %48 : vector<1x128xf32>
    %50 = arith.addf %39, %49 : vector<1x128xf32>
    %c0_35 = arith.constant 0 : index
    %c2_36 = arith.constant 2 : index
    %51 = memref.load %arg3[%c0_35, %c2_36] : memref<2x9xf32, #tpu.memory_space<smem>>
    %52 = vector.broadcast %51 : f32 to vector<1x128xf32>
    %53 = arith.mulf %52, %17 : vector<1x128xf32>
    %c1_37 = arith.constant 1 : index
    %c2_38 = arith.constant 2 : index
    %54 = memref.load %arg3[%c1_37, %c2_38] : memref<2x9xf32, #tpu.memory_space<smem>>
    %55 = vector.broadcast %54 : f32 to vector<1x128xf32>
    %56 = arith.mulf %55, %21 : vector<1x128xf32>
    %57 = arith.addf %53, %56 : vector<1x128xf32>
    %c15_i32 = arith.constant 15 : i32
    %58 = tpu.dynamic_rotate %57 by %c15_i32 dim 1 : vector<1x128xf32>, i32 -> vector<1x128xf32>
    %59 = vector.extract_strided_slice %0 {offsets = [2, 0], sizes = [1, 128], strides = [1, 1]} : vector<9x128xf32> to vector<1x128xf32>
    %60 = arith.mulf %58, %59 : vector<1x128xf32>
    %61 = arith.addf %50, %60 : vector<1x128xf32>
    %c0_39 = arith.constant 0 : index
    %c3_40 = arith.constant 3 : index
    %62 = memref.load %arg3[%c0_39, %c3_40] : memref<2x9xf32, #tpu.memory_space<smem>>
    %63 = vector.broadcast %62 : f32 to vector<1x128xf32>
    %64 = arith.mulf %63, %17 : vector<1x128xf32>
    %c1_41 = arith.constant 1 : index
    %c3_42 = arith.constant 3 : index
    %65 = memref.load %arg3[%c1_41, %c3_42] : memref<2x9xf32, #tpu.memory_space<smem>>
    %66 = vector.broadcast %65 : f32 to vector<1x128xf32>
    %67 = arith.mulf %66, %21 : vector<1x128xf32>
    %68 = arith.addf %64, %67 : vector<1x128xf32>
    %c1_i32 = arith.constant 1 : i32
    %69 = tpu.dynamic_rotate %68 by %c1_i32 dim 1 : vector<1x128xf32>, i32 -> vector<1x128xf32>
    %70 = vector.extract_strided_slice %0 {offsets = [3, 0], sizes = [1, 128], strides = [1, 1]} : vector<9x128xf32> to vector<1x128xf32>
    %71 = arith.mulf %69, %70 : vector<1x128xf32>
    %72 = arith.addf %61, %71 : vector<1x128xf32>
    %c0_43 = arith.constant 0 : index
    %c5 = arith.constant 5 : index
    %73 = memref.load %arg3[%c0_43, %c5] : memref<2x9xf32, #tpu.memory_space<smem>>
    %74 = vector.broadcast %73 : f32 to vector<1x128xf32>
    %75 = arith.mulf %74, %17 : vector<1x128xf32>
    %c1_44 = arith.constant 1 : index
    %c5_45 = arith.constant 5 : index
    %76 = memref.load %arg3[%c1_44, %c5_45] : memref<2x9xf32, #tpu.memory_space<smem>>
    %77 = vector.broadcast %76 : f32 to vector<1x128xf32>
    %78 = arith.mulf %77, %21 : vector<1x128xf32>
    %79 = arith.addf %75, %78 : vector<1x128xf32>
    %c127_i32 = arith.constant 127 : i32
    %80 = tpu.dynamic_rotate %79 by %c127_i32 dim 1 : vector<1x128xf32>, i32 -> vector<1x128xf32>
    %81 = vector.extract_strided_slice %0 {offsets = [5, 0], sizes = [1, 128], strides = [1, 1]} : vector<9x128xf32> to vector<1x128xf32>
    %82 = arith.mulf %80, %81 : vector<1x128xf32>
    %83 = arith.addf %72, %82 : vector<1x128xf32>
    %c0_46 = arith.constant 0 : index
    %c6 = arith.constant 6 : index
    %84 = memref.load %arg3[%c0_46, %c6] : memref<2x9xf32, #tpu.memory_space<smem>>
    %85 = vector.broadcast %84 : f32 to vector<1x128xf32>
    %86 = arith.mulf %85, %17 : vector<1x128xf32>
    %c1_47 = arith.constant 1 : index
    %c6_48 = arith.constant 6 : index
    %87 = memref.load %arg3[%c1_47, %c6_48] : memref<2x9xf32, #tpu.memory_space<smem>>
    %88 = vector.broadcast %87 : f32 to vector<1x128xf32>
    %89 = arith.mulf %88, %21 : vector<1x128xf32>
    %90 = arith.addf %86, %89 : vector<1x128xf32>
    %c113_i32 = arith.constant 113 : i32
    %91 = tpu.dynamic_rotate %90 by %c113_i32 dim 1 : vector<1x128xf32>, i32 -> vector<1x128xf32>
    %92 = vector.extract_strided_slice %0 {offsets = [6, 0], sizes = [1, 128], strides = [1, 1]} : vector<9x128xf32> to vector<1x128xf32>
    %93 = arith.mulf %91, %92 : vector<1x128xf32>
    %94 = arith.addf %83, %93 : vector<1x128xf32>
    %c0_49 = arith.constant 0 : index
    %c7 = arith.constant 7 : index
    %95 = memref.load %arg3[%c0_49, %c7] : memref<2x9xf32, #tpu.memory_space<smem>>
    %96 = vector.broadcast %95 : f32 to vector<1x128xf32>
    %97 = arith.mulf %96, %17 : vector<1x128xf32>
    %c1_50 = arith.constant 1 : index
    %c7_51 = arith.constant 7 : index
    %98 = memref.load %arg3[%c1_50, %c7_51] : memref<2x9xf32, #tpu.memory_space<smem>>
    %99 = vector.broadcast %98 : f32 to vector<1x128xf32>
    %100 = arith.mulf %99, %21 : vector<1x128xf32>
    %101 = arith.addf %97, %100 : vector<1x128xf32>
    %c112_i32 = arith.constant 112 : i32
    %102 = tpu.dynamic_rotate %101 by %c112_i32 dim 1 : vector<1x128xf32>, i32 -> vector<1x128xf32>
    %103 = vector.extract_strided_slice %0 {offsets = [7, 0], sizes = [1, 128], strides = [1, 1]} : vector<9x128xf32> to vector<1x128xf32>
    %104 = arith.mulf %102, %103 : vector<1x128xf32>
    %105 = arith.addf %94, %104 : vector<1x128xf32>
    %c0_52 = arith.constant 0 : index
    %c8 = arith.constant 8 : index
    %106 = memref.load %arg3[%c0_52, %c8] : memref<2x9xf32, #tpu.memory_space<smem>>
    %107 = vector.broadcast %106 : f32 to vector<1x128xf32>
    %108 = arith.mulf %107, %17 : vector<1x128xf32>
    %c1_53 = arith.constant 1 : index
    %c8_54 = arith.constant 8 : index
    %109 = memref.load %arg3[%c1_53, %c8_54] : memref<2x9xf32, #tpu.memory_space<smem>>
    %110 = vector.broadcast %109 : f32 to vector<1x128xf32>
    %111 = arith.mulf %110, %21 : vector<1x128xf32>
    %112 = arith.addf %108, %111 : vector<1x128xf32>
    %c111_i32 = arith.constant 111 : i32
    %113 = tpu.dynamic_rotate %112 by %c111_i32 dim 1 : vector<1x128xf32>, i32 -> vector<1x128xf32>
    %114 = vector.extract_strided_slice %0 {offsets = [8, 0], sizes = [1, 128], strides = [1, 1]} : vector<9x128xf32> to vector<1x128xf32>
    %115 = arith.mulf %113, %114 : vector<1x128xf32>
    %116 = arith.addf %105, %115 : vector<1x128xf32>
    %cst_55 = arith.constant 0.000000e+00 : f32
    %117 = vector.broadcast %cst_55 : f32 to vector<1x128xf32>
    %118 = arith.subf %117, %116 : vector<1x128xf32>
    %119 = math.exp %118 : vector<1x128xf32>
    %cst_56 = arith.constant 1.000000e+00 : f32
    %120 = vector.broadcast %cst_56 : f32 to vector<1x128xf32>
    %121 = arith.addf %120, %119 : vector<1x128xf32>
    %122 = tpu.reciprocal %121 {approx = true} : vector<1x128xf32> -> vector<1x128xf32>
    %cst_57 = arith.constant dense<0.000000e+00> : vector<8xf32>
    %123 = vector.multi_reduction <add>, %12, %cst_57 [1] : vector<8x128xf32> to vector<8xf32>
    %124 = vector.shape_cast %123 : vector<8xf32> to vector<8x1xf32>
    %cst_58 = arith.constant 1.280000e+02 : f32
    %125 = vector.broadcast %cst_58 : f32 to vector<8x1xf32>
    %126 = arith.divf %124, %125 : vector<8x1xf32>
    %cst_59 = arith.constant dense<0.000000e+00> : vector<8x1xf32>
    %127 = tpu.matmul %1, %126, %cst_59 {dimension_numbers = #tpu.dot_dimension_numbers<[1], [0], [0], [1], [0, 0, 1, 1], [], []>} : vector<8x8xf32>, vector<8x1xf32>, vector<8x1xf32> -> vector<8x1xf32>
    %cst_60 = arith.constant 0.000000e+00 : f32
    %128 = vector.broadcast %cst_60 : f32 to vector<8x1xf32>
    %129 = arith.subf %128, %127 : vector<8x1xf32>
    %130 = math.exp %129 : vector<8x1xf32>
    %cst_61 = arith.constant 1.000000e+00 : f32
    %131 = vector.broadcast %cst_61 : f32 to vector<8x1xf32>
    %132 = arith.addf %131, %130 : vector<8x1xf32>
    %133 = tpu.reciprocal %132 {approx = true} : vector<8x1xf32> -> vector<8x1xf32>
    %134 = vector.broadcast %122 : vector<1x128xf32> to vector<8x128xf32>
    %135 = arith.mulf %12, %134 : vector<8x128xf32>
    %136 = vector.broadcast %133 : vector<8x1xf32> to vector<8x128xf32>
    %137 = arith.mulf %12, %136 : vector<8x128xf32>
    %138 = arith.addf %135, %137 : vector<8x128xf32>
    %cst_62 = arith.constant dense<0.000000e+00> : vector<8x128xf32>
    %139 = tpu.matmul %2, %13, %cst_62 {dimension_numbers = #tpu.dot_dimension_numbers<[1], [0], [0], [1], [0, 0, 1, 1], [], []>} : vector<8x8xbf16>, vector<8x128xbf16>, vector<8x128xf32> -> vector<8x128xf32>
    %140 = vector.broadcast %6 : vector<8x1xf32> to vector<8x128xf32>
    %141 = arith.addf %139, %140 : vector<8x128xf32>
    %142 = arith.truncf %138 : vector<8x128xf32> to vector<8x128xbf16>
    %cst_63 = arith.constant dense<0.000000e+00> : vector<2x128xf32>
    %143 = tpu.matmul %3, %142, %cst_63 {dimension_numbers = #tpu.dot_dimension_numbers<[1], [0], [0], [1], [0, 0, 1, 1], [], []>} : vector<2x8xbf16>, vector<8x128xbf16>, vector<2x128xf32> -> vector<2x128xf32>
    %cst_64 = arith.constant dense<0.000000e+00> : vector<2x128xf32>
    %144 = tpu.matmul %4, %13, %cst_64 {dimension_numbers = #tpu.dot_dimension_numbers<[1], [0], [0], [1], [0, 0, 1, 1], [], []>} : vector<2x8xbf16>, vector<8x128xbf16>, vector<2x128xf32> -> vector<2x128xf32>
    %145 = arith.addf %143, %144 : vector<2x128xf32>
    %146 = vector.broadcast %10 : vector<2x1xf32> to vector<2x128xf32>
    %147 = arith.addf %145, %146 : vector<2x128xf32>
    %cst_65 = arith.constant 0.000000e+00 : f32
    %148 = vector.broadcast %cst_65 : f32 to vector<2x128xf32>
    %149 = arith.maximumf %147, %148 : vector<2x128xf32>
    %150 = arith.truncf %149 : vector<2x128xf32> to vector<2x128xbf16>
    %cst_66 = arith.constant dense<0.000000e+00> : vector<8x128xf32>
    %151 = tpu.matmul %5, %150, %cst_66 {dimension_numbers = #tpu.dot_dimension_numbers<[1], [0], [0], [1], [0, 0, 1, 1], [], []>} : vector<8x2xbf16>, vector<2x128xbf16>, vector<8x128xf32> -> vector<8x128xf32>
    %152 = vector.broadcast %7 : vector<8x1xf32> to vector<8x128xf32>
    %153 = arith.addf %151, %152 : vector<8x128xf32>
    %cst_67 = arith.constant dense<0xFF800000> : vector<8xf32>
    %154 = vector.multi_reduction <maximumf>, %153, %cst_67 [1] : vector<8x128xf32> to vector<8xf32>
    %155 = vector.shape_cast %154 : vector<8xf32> to vector<8x1xf32>
    %156 = vector.broadcast %155 : vector<8x1xf32> to vector<8x128xf32>
    %157 = arith.subf %153, %156 : vector<8x128xf32>
    %158 = math.exp %157 : vector<8x128xf32>
    %cst_68 = arith.constant dense<0.000000e+00> : vector<8xf32>
    %159 = vector.multi_reduction <add>, %158, %cst_68 [1] : vector<8x128xf32> to vector<8xf32>
    %160 = vector.shape_cast %159 : vector<8xf32> to vector<8x1xf32>
    %161 = tpu.reciprocal %160 {approx = true} : vector<8x1xf32> -> vector<8x1xf32>
    %162 = vector.broadcast %161 : vector<8x1xf32> to vector<8x128xf32>
    %163 = arith.mulf %158, %162 : vector<8x128xf32>
    %164 = arith.mulf %163, %141 : vector<8x128xf32>
    %165 = arith.addf %138, %164 : vector<8x128xf32>
    %166 = vector.broadcast %8 : vector<8x1xf32> to vector<8x128xf32>
    %167 = arith.mulf %165, %166 : vector<8x128xf32>
    %168 = vector.broadcast %9 : vector<8x1xf32> to vector<8x128xf32>
    %169 = arith.addf %167, %168 : vector<8x128xf32>
    %170 = arith.addf %169, %12 : vector<8x128xf32>
    %cst_69 = arith.constant 0.000000e+00 : f32
    %171 = vector.broadcast %cst_69 : f32 to vector<8x128xf32>
    %172 = arith.maximumf %170, %171 : vector<8x128xf32>
    %c0_70 = arith.constant 0 : index
    %c0_71 = arith.constant 0 : index
    %c0_72 = arith.constant 0 : index
    %173 = vector.load %arg11[%c0_70, %c0_71, %c0_72] : memref<2x8x128xf32, #tpu.memory_space<vmem>>, vector<1x8x128xf32>
    %174 = vector.shape_cast %173 : vector<1x8x128xf32> to vector<8x128xf32>
    %175 = vector.shape_cast %172 : vector<8x128xf32> to vector<1x8x128xf32>
    tpu.vector_store %arg11[%c0_70, %c0_71, %c0_72], %175 {strides = array<i32>} : memref<2x8x128xf32, #tpu.memory_space<vmem>>, vector<1x8x128xf32>,
    %c1_73 = arith.constant 1 : index
    %c0_74 = arith.constant 0 : index
    %c0_75 = arith.constant 0 : index
    %176 = vector.load %arg1[%c1_73, %c0_74, %c0_75] : memref<2x8x128xf32, #tpu.memory_space<vmem>>, vector<1x8x128xf32>
    %177 = vector.shape_cast %176 : vector<1x8x128xf32> to vector<8x128xf32>
    %178 = arith.truncf %177 : vector<8x128xf32> to vector<8x128xbf16>
    %cst_76 = arith.constant dense<0.000000e+00> : vector<128xf32>
    %179 = vector.multi_reduction <add>, %177, %cst_76 [0] : vector<8x128xf32> to vector<128xf32>
    %180 = vector.shape_cast %179 : vector<128xf32> to vector<1x128xf32>
    %cst_77 = arith.constant 8.000000e+00 : f32
    %181 = vector.broadcast %cst_77 : f32 to vector<1x128xf32>
    %182 = arith.divf %180, %181 : vector<1x128xf32>
    %cst_78 = arith.constant dense<0.000000e+00> : vector<128xf32>
    %183 = vector.multi_reduction <add>, %177, %cst_78 [0] : vector<8x128xf32> to vector<128xf32>
    %184 = vector.shape_cast %183 : vector<128xf32> to vector<1x128xf32>
    %cst_79 = arith.constant 8.000000e+00 : f32
    %185 = vector.broadcast %cst_79 : f32 to vector<1x128xf32>
    %186 = arith.divf %184, %185 : vector<1x128xf32>
    %c0_80 = arith.constant 0 : index
    %c4_81 = arith.constant 4 : index
    %187 = memref.load %arg3[%c0_80, %c4_81] : memref<2x9xf32, #tpu.memory_space<smem>>
    %188 = vector.broadcast %187 : f32 to vector<1x128xf32>
    %189 = arith.mulf %188, %182 : vector<1x128xf32>
    %c1_82 = arith.constant 1 : index
    %c4_83 = arith.constant 4 : index
    %190 = memref.load %arg3[%c1_82, %c4_83] : memref<2x9xf32, #tpu.memory_space<smem>>
    %191 = vector.broadcast %190 : f32 to vector<1x128xf32>
    %192 = arith.mulf %191, %186 : vector<1x128xf32>
    %193 = arith.addf %189, %192 : vector<1x128xf32>
    %c0_84 = arith.constant 0 : index
    %c0_85 = arith.constant 0 : index
    %194 = memref.load %arg3[%c0_84, %c0_85] : memref<2x9xf32, #tpu.memory_space<smem>>
    %195 = vector.broadcast %194 : f32 to vector<1x128xf32>
    %196 = arith.mulf %195, %182 : vector<1x128xf32>
    %c1_86 = arith.constant 1 : index
    %c0_87 = arith.constant 0 : index
    %197 = memref.load %arg3[%c1_86, %c0_87] : memref<2x9xf32, #tpu.memory_space<smem>>
    %198 = vector.broadcast %197 : f32 to vector<1x128xf32>
    %199 = arith.mulf %198, %186 : vector<1x128xf32>
    %200 = arith.addf %196, %199 : vector<1x128xf32>
    %c17_i32_88 = arith.constant 17 : i32
    %201 = tpu.dynamic_rotate %200 by %c17_i32_88 dim 1 : vector<1x128xf32>, i32 -> vector<1x128xf32>
    %202 = vector.extract_strided_slice %0 {offsets = [0, 0], sizes = [1, 128], strides = [1, 1]} : vector<9x128xf32> to vector<1x128xf32>
    %203 = arith.mulf %201, %202 : vector<1x128xf32>
    %204 = arith.addf %193, %203 : vector<1x128xf32>
    %c0_89 = arith.constant 0 : index
    %c1_90 = arith.constant 1 : index
    %205 = memref.load %arg3[%c0_89, %c1_90] : memref<2x9xf32, #tpu.memory_space<smem>>
    %206 = vector.broadcast %205 : f32 to vector<1x128xf32>
    %207 = arith.mulf %206, %182 : vector<1x128xf32>
    %c1_91 = arith.constant 1 : index
    %c1_92 = arith.constant 1 : index
    %208 = memref.load %arg3[%c1_91, %c1_92] : memref<2x9xf32, #tpu.memory_space<smem>>
    %209 = vector.broadcast %208 : f32 to vector<1x128xf32>
    %210 = arith.mulf %209, %186 : vector<1x128xf32>
    %211 = arith.addf %207, %210 : vector<1x128xf32>
    %c16_i32_93 = arith.constant 16 : i32
    %212 = tpu.dynamic_rotate %211 by %c16_i32_93 dim 1 : vector<1x128xf32>, i32 -> vector<1x128xf32>
    %213 = vector.extract_strided_slice %0 {offsets = [1, 0], sizes = [1, 128], strides = [1, 1]} : vector<9x128xf32> to vector<1x128xf32>
    %214 = arith.mulf %212, %213 : vector<1x128xf32>
    %215 = arith.addf %204, %214 : vector<1x128xf32>
    %c0_94 = arith.constant 0 : index
    %c2_95 = arith.constant 2 : index
    %216 = memref.load %arg3[%c0_94, %c2_95] : memref<2x9xf32, #tpu.memory_space<smem>>
    %217 = vector.broadcast %216 : f32 to vector<1x128xf32>
    %218 = arith.mulf %217, %182 : vector<1x128xf32>
    %c1_96 = arith.constant 1 : index
    %c2_97 = arith.constant 2 : index
    %219 = memref.load %arg3[%c1_96, %c2_97] : memref<2x9xf32, #tpu.memory_space<smem>>
    %220 = vector.broadcast %219 : f32 to vector<1x128xf32>
    %221 = arith.mulf %220, %186 : vector<1x128xf32>
    %222 = arith.addf %218, %221 : vector<1x128xf32>
    %c15_i32_98 = arith.constant 15 : i32
    %223 = tpu.dynamic_rotate %222 by %c15_i32_98 dim 1 : vector<1x128xf32>, i32 -> vector<1x128xf32>
    %224 = vector.extract_strided_slice %0 {offsets = [2, 0], sizes = [1, 128], strides = [1, 1]} : vector<9x128xf32> to vector<1x128xf32>
    %225 = arith.mulf %223, %224 : vector<1x128xf32>
    %226 = arith.addf %215, %225 : vector<1x128xf32>
    %c0_99 = arith.constant 0 : index
    %c3_100 = arith.constant 3 : index
    %227 = memref.load %arg3[%c0_99, %c3_100] : memref<2x9xf32, #tpu.memory_space<smem>>
    %228 = vector.broadcast %227 : f32 to vector<1x128xf32>
    %229 = arith.mulf %228, %182 : vector<1x128xf32>
    %c1_101 = arith.constant 1 : index
    %c3_102 = arith.constant 3 : index
    %230 = memref.load %arg3[%c1_101, %c3_102] : memref<2x9xf32, #tpu.memory_space<smem>>
    %231 = vector.broadcast %230 : f32 to vector<1x128xf32>
    %232 = arith.mulf %231, %186 : vector<1x128xf32>
    %233 = arith.addf %229, %232 : vector<1x128xf32>
    %c1_i32_103 = arith.constant 1 : i32
    %234 = tpu.dynamic_rotate %233 by %c1_i32_103 dim 1 : vector<1x128xf32>, i32 -> vector<1x128xf32>
    %235 = vector.extract_strided_slice %0 {offsets = [3, 0], sizes = [1, 128], strides = [1, 1]} : vector<9x128xf32> to vector<1x128xf32>
    %236 = arith.mulf %234, %235 : vector<1x128xf32>
    %237 = arith.addf %226, %236 : vector<1x128xf32>
    %c0_104 = arith.constant 0 : index
    %c5_105 = arith.constant 5 : index
    %238 = memref.load %arg3[%c0_104, %c5_105] : memref<2x9xf32, #tpu.memory_space<smem>>
    %239 = vector.broadcast %238 : f32 to vector<1x128xf32>
    %240 = arith.mulf %239, %182 : vector<1x128xf32>
    %c1_106 = arith.constant 1 : index
    %c5_107 = arith.constant 5 : index
    %241 = memref.load %arg3[%c1_106, %c5_107] : memref<2x9xf32, #tpu.memory_space<smem>>
    %242 = vector.broadcast %241 : f32 to vector<1x128xf32>
    %243 = arith.mulf %242, %186 : vector<1x128xf32>
    %244 = arith.addf %240, %243 : vector<1x128xf32>
    %c127_i32_108 = arith.constant 127 : i32
    %245 = tpu.dynamic_rotate %244 by %c127_i32_108 dim 1 : vector<1x128xf32>, i32 -> vector<1x128xf32>
    %246 = vector.extract_strided_slice %0 {offsets = [5, 0], sizes = [1, 128], strides = [1, 1]} : vector<9x128xf32> to vector<1x128xf32>
    %247 = arith.mulf %245, %246 : vector<1x128xf32>
    %248 = arith.addf %237, %247 : vector<1x128xf32>
    %c0_109 = arith.constant 0 : index
    %c6_110 = arith.constant 6 : index
    %249 = memref.load %arg3[%c0_109, %c6_110] : memref<2x9xf32, #tpu.memory_space<smem>>
    %250 = vector.broadcast %249 : f32 to vector<1x128xf32>
    %251 = arith.mulf %250, %182 : vector<1x128xf32>
    %c1_111 = arith.constant 1 : index
    %c6_112 = arith.constant 6 : index
    %252 = memref.load %arg3[%c1_111, %c6_112] : memref<2x9xf32, #tpu.memory_space<smem>>
    %253 = vector.broadcast %252 : f32 to vector<1x128xf32>
    %254 = arith.mulf %253, %186 : vector<1x128xf32>
    %255 = arith.addf %251, %254 : vector<1x128xf32>
    %c113_i32_113 = arith.constant 113 : i32
    %256 = tpu.dynamic_rotate %255 by %c113_i32_113 dim 1 : vector<1x128xf32>, i32 -> vector<1x128xf32>
    %257 = vector.extract_strided_slice %0 {offsets = [6, 0], sizes = [1, 128], strides = [1, 1]} : vector<9x128xf32> to vector<1x128xf32>
    %258 = arith.mulf %256, %257 : vector<1x128xf32>
    %259 = arith.addf %248, %258 : vector<1x128xf32>
    %c0_114 = arith.constant 0 : index
    %c7_115 = arith.constant 7 : index
    %260 = memref.load %arg3[%c0_114, %c7_115] : memref<2x9xf32, #tpu.memory_space<smem>>
    %261 = vector.broadcast %260 : f32 to vector<1x128xf32>
    %262 = arith.mulf %261, %182 : vector<1x128xf32>
    %c1_116 = arith.constant 1 : index
    %c7_117 = arith.constant 7 : index
    %263 = memref.load %arg3[%c1_116, %c7_117] : memref<2x9xf32, #tpu.memory_space<smem>>
    %264 = vector.broadcast %263 : f32 to vector<1x128xf32>
    %265 = arith.mulf %264, %186 : vector<1x128xf32>
    %266 = arith.addf %262, %265 : vector<1x128xf32>
    %c112_i32_118 = arith.constant 112 : i32
    %267 = tpu.dynamic_rotate %266 by %c112_i32_118 dim 1 : vector<1x128xf32>, i32 -> vector<1x128xf32>
    %268 = vector.extract_strided_slice %0 {offsets = [7, 0], sizes = [1, 128], strides = [1, 1]} : vector<9x128xf32> to vector<1x128xf32>
    %269 = arith.mulf %267, %268 : vector<1x128xf32>
    %270 = arith.addf %259, %269 : vector<1x128xf32>
    %c0_119 = arith.constant 0 : index
    %c8_120 = arith.constant 8 : index
    %271 = memref.load %arg3[%c0_119, %c8_120] : memref<2x9xf32, #tpu.memory_space<smem>>
    %272 = vector.broadcast %271 : f32 to vector<1x128xf32>
    %273 = arith.mulf %272, %182 : vector<1x128xf32>
    %c1_121 = arith.constant 1 : index
    %c8_122 = arith.constant 8 : index
    %274 = memref.load %arg3[%c1_121, %c8_122] : memref<2x9xf32, #tpu.memory_space<smem>>
    %275 = vector.broadcast %274 : f32 to vector<1x128xf32>
    %276 = arith.mulf %275, %186 : vector<1x128xf32>
    %277 = arith.addf %273, %276 : vector<1x128xf32>
    %c111_i32_123 = arith.constant 111 : i32
    %278 = tpu.dynamic_rotate %277 by %c111_i32_123 dim 1 : vector<1x128xf32>, i32 -> vector<1x128xf32>
    %279 = vector.extract_strided_slice %0 {offsets = [8, 0], sizes = [1, 128], strides = [1, 1]} : vector<9x128xf32> to vector<1x128xf32>
    %280 = arith.mulf %278, %279 : vector<1x128xf32>
    %281 = arith.addf %270, %280 : vector<1x128xf32>
    %cst_124 = arith.constant 0.000000e+00 : f32
    %282 = vector.broadcast %cst_124 : f32 to vector<1x128xf32>
    %283 = arith.subf %282, %281 : vector<1x128xf32>
    %284 = math.exp %283 : vector<1x128xf32>
    %cst_125 = arith.constant 1.000000e+00 : f32
    %285 = vector.broadcast %cst_125 : f32 to vector<1x128xf32>
    %286 = arith.addf %285, %284 : vector<1x128xf32>
    %287 = tpu.reciprocal %286 {approx = true} : vector<1x128xf32> -> vector<1x128xf32>
    %cst_126 = arith.constant dense<0.000000e+00> : vector<8xf32>
    %288 = vector.multi_reduction <add>, %177, %cst_126 [1] : vector<8x128xf32> to vector<8xf32>
    %289 = vector.shape_cast %288 : vector<8xf32> to vector<8x1xf32>
    %cst_127 = arith.constant 1.280000e+02 : f32
    %290 = vector.broadcast %cst_127 : f32 to vector<8x1xf32>
    %291 = arith.divf %289, %290 : vector<8x1xf32>
    %cst_128 = arith.constant dense<0.000000e+00> : vector<8x1xf32>
    %292 = tpu.matmul %1, %291, %cst_128 {dimension_numbers = #tpu.dot_dimension_numbers<[1], [0], [0], [1], [0, 0, 1, 1], [], []>} : vector<8x8xf32>, vector<8x1xf32>, vector<8x1xf32> -> vector<8x1xf32>
    %cst_129 = arith.constant 0.000000e+00 : f32
    %293 = vector.broadcast %cst_129 : f32 to vector<8x1xf32>
    %294 = arith.subf %293, %292 : vector<8x1xf32>
    %295 = math.exp %294 : vector<8x1xf32>
    %cst_130 = arith.constant 1.000000e+00 : f32
    %296 = vector.broadcast %cst_130 : f32 to vector<8x1xf32>
    %297 = arith.addf %296, %295 : vector<8x1xf32>
    %298 = tpu.reciprocal %297 {approx = true} : vector<8x1xf32> -> vector<8x1xf32>
    %299 = vector.broadcast %287 : vector<1x128xf32> to vector<8x128xf32>
    %300 = arith.mulf %177, %299 : vector<8x128xf32>
    %301 = vector.broadcast %298 : vector<8x1xf32> to vector<8x128xf32>
    %302 = arith.mulf %177, %301 : vector<8x128xf32>
    %303 = arith.addf %300, %302 : vector<8x128xf32>
    %cst_131 = arith.constant dense<0.000000e+00> : vector<8x128xf32>
    %304 = tpu.matmul %2, %178, %cst_131 {dimension_numbers = #tpu.dot_dimension_numbers<[1], [0], [0], [1], [0, 0, 1, 1], [], []>} : vector<8x8xbf16>, vector<8x128xbf16>, vector<8x128xf32> -> vector<8x128xf32>
    %305 = vector.broadcast %6 : vector<8x1xf32> to vector<8x128xf32>
    %306 = arith.addf %304, %305 : vector<8x128xf32>
    %307 = arith.truncf %303 : vector<8x128xf32> to vector<8x128xbf16>
    %cst_132 = arith.constant dense<0.000000e+00> : vector<2x128xf32>
    %308 = tpu.matmul %3, %307, %cst_132 {dimension_numbers = #tpu.dot_dimension_numbers<[1], [0], [0], [1], [0, 0, 1, 1], [], []>} : vector<2x8xbf16>, vector<8x128xbf16>, vector<2x128xf32> -> vector<2x128xf32>
    %cst_133 = arith.constant dense<0.000000e+00> : vector<2x128xf32>
    %309 = tpu.matmul %4, %178, %cst_133 {dimension_numbers = #tpu.dot_dimension_numbers<[1], [0], [0], [1], [0, 0, 1, 1], [], []>} : vector<2x8xbf16>, vector<8x128xbf16>, vector<2x128xf32> -> vector<2x128xf32>
    %310 = arith.addf %308, %309 : vector<2x128xf32>
    %311 = vector.broadcast %10 : vector<2x1xf32> to vector<2x128xf32>
    %312 = arith.addf %310, %311 : vector<2x128xf32>
    %cst_134 = arith.constant 0.000000e+00 : f32
    %313 = vector.broadcast %cst_134 : f32 to vector<2x128xf32>
    %314 = arith.maximumf %312, %313 : vector<2x128xf32>
    %315 = arith.truncf %314 : vector<2x128xf32> to vector<2x128xbf16>
    %cst_135 = arith.constant dense<0.000000e+00> : vector<8x128xf32>
    %316 = tpu.matmul %5, %315, %cst_135 {dimension_numbers = #tpu.dot_dimension_numbers<[1], [0], [0], [1], [0, 0, 1, 1], [], []>} : vector<8x2xbf16>, vector<2x128xbf16>, vector<8x128xf32> -> vector<8x128xf32>
    %317 = vector.broadcast %7 : vector<8x1xf32> to vector<8x128xf32>
    %318 = arith.addf %316, %317 : vector<8x128xf32>
    %cst_136 = arith.constant dense<0xFF800000> : vector<8xf32>
    %319 = vector.multi_reduction <maximumf>, %318, %cst_136 [1] : vector<8x128xf32> to vector<8xf32>
    %320 = vector.shape_cast %319 : vector<8xf32> to vector<8x1xf32>
    %321 = vector.broadcast %320 : vector<8x1xf32> to vector<8x128xf32>
    %322 = arith.subf %318, %321 : vector<8x128xf32>
    %323 = math.exp %322 : vector<8x128xf32>
    %cst_137 = arith.constant dense<0.000000e+00> : vector<8xf32>
    %324 = vector.multi_reduction <add>, %323, %cst_137 [1] : vector<8x128xf32> to vector<8xf32>
    %325 = vector.shape_cast %324 : vector<8xf32> to vector<8x1xf32>
    %326 = tpu.reciprocal %325 {approx = true} : vector<8x1xf32> -> vector<8x1xf32>
    %327 = vector.broadcast %326 : vector<8x1xf32> to vector<8x128xf32>
    %328 = arith.mulf %323, %327 : vector<8x128xf32>
    %329 = arith.mulf %328, %306 : vector<8x128xf32>
    %330 = arith.addf %303, %329 : vector<8x128xf32>
    %331 = vector.broadcast %8 : vector<8x1xf32> to vector<8x128xf32>
    %332 = arith.mulf %330, %331 : vector<8x128xf32>
    %333 = vector.broadcast %9 : vector<8x1xf32> to vector<8x128xf32>
    %334 = arith.addf %332, %333 : vector<8x128xf32>
    %335 = arith.addf %334, %177 : vector<8x128xf32>
    %cst_138 = arith.constant 0.000000e+00 : f32
    %336 = vector.broadcast %cst_138 : f32 to vector<8x128xf32>
    %337 = arith.maximumf %335, %336 : vector<8x128xf32>
    %c1_139 = arith.constant 1 : index
    %c0_140 = arith.constant 0 : index
    %c0_141 = arith.constant 0 : index
    %338 = vector.load %arg11[%c1_139, %c0_140, %c0_141] : memref<2x8x128xf32, #tpu.memory_space<vmem>>, vector<1x8x128xf32>
    %339 = vector.shape_cast %338 : vector<1x8x128xf32> to vector<8x128xf32>
    %340 = vector.shape_cast %337 : vector<8x128xf32> to vector<1x8x128xf32>
    tpu.vector_store %arg11[%c1_139, %c0_140, %c0_141], %340 {strides = array<i32>} : memref<2x8x128xf32, #tpu.memory_space<vmem>>, vector<1x8x128xf32>,
    return
  }
  func.func @transform_0(%arg0: i32) -> (i32, i32, i32) {
    %c0_i32 = arith.constant 0 : i32
    %c0_i32_0 = arith.constant 0 : i32
    %c0_i32_1 = arith.constant 0 : i32
    return %arg0, %c0_i32, %c0_i32_0 : i32, i32, i32
  }
  func.func @transform_1(%arg0: i32) -> (i32, i32) {
    %c0_i32 = arith.constant 0 : i32
    %c0_i32_0 = arith.constant 0 : i32
    %c0_i32_1 = arith.constant 0 : i32
    return %c0_i32, %c0_i32_0 : i32, i32
  }
  func.func @transform_2(%arg0: i32) -> (i32, i32) {
    %c0_i32 = arith.constant 0 : i32
    %c0_i32_0 = arith.constant 0 : i32
    %c0_i32_1 = arith.constant 0 : i32
    return %c0_i32, %c0_i32_0 : i32, i32
  }
  func.func @transform_3(%arg0: i32) -> (i32, i32) {
    %c0_i32 = arith.constant 0 : i32
    %c0_i32_0 = arith.constant 0 : i32
    %c0_i32_1 = arith.constant 0 : i32
    return %c0_i32, %c0_i32_0 : i32, i32
  }
  func.func @transform_4(%arg0: i32) -> (i32, i32) {
    %c0_i32 = arith.constant 0 : i32
    %c0_i32_0 = arith.constant 0 : i32
    %c0_i32_1 = arith.constant 0 : i32
    return %c0_i32, %c0_i32_0 : i32, i32
  }
  func.func @transform_5(%arg0: i32) -> (i32, i32) {
    %c0_i32 = arith.constant 0 : i32
    %c0_i32_0 = arith.constant 0 : i32
    %c0_i32_1 = arith.constant 0 : i32
    return %c0_i32, %c0_i32_0 : i32, i32
  }
  func.func @transform_6(%arg0: i32) -> (i32, i32) {
    %c0_i32 = arith.constant 0 : i32
    %c0_i32_0 = arith.constant 0 : i32
    %c0_i32_1 = arith.constant 0 : i32
    return %c0_i32, %c0_i32_0 : i32, i32
  }
  func.func @transform_7(%arg0: i32) -> (i32, i32) {
    %c0_i32 = arith.constant 0 : i32
    %c0_i32_0 = arith.constant 0 : i32
    %c0_i32_1 = arith.constant 0 : i32
    return %c0_i32, %c0_i32_0 : i32, i32
  }
  func.func @transform_8(%arg0: i32) -> (i32, i32) {
    %c0_i32 = arith.constant 0 : i32
    %c0_i32_0 = arith.constant 0 : i32
    %c0_i32_1 = arith.constant 0 : i32
    return %c0_i32, %c0_i32_0 : i32, i32
  }
  func.func @transform_9(%arg0: i32) -> (i32, i32) {
    %c0_i32 = arith.constant 0 : i32
    %c0_i32_0 = arith.constant 0 : i32
    %c0_i32_1 = arith.constant 0 : i32
    return %c0_i32, %c0_i32_0 : i32, i32
  }
  func.func @transform_10(%arg0: i32) -> (i32, i32, i32) {
    %c0_i32 = arith.constant 0 : i32
    %c0_i32_0 = arith.constant 0 : i32
    %c0_i32_1 = arith.constant 0 : i32
    return %arg0, %c0_i32, %c0_i32_0 : i32, i32, i32
  }
}

</mosaic_0001>

<bundles_post_ra>
// kernel: tpu_custom_call.1
= control target key start
LH: loop header
LB: loop body
LE: loop exit
PB: predicated region body
PF: predicated region fallthrough
CT: control target
= control target key end

     0   :  { %15 = vsyncpa [#allocation3], 0  ;;  %s1711_s0 = inlined_call_operand.vmem [shape: f32[2,8,128], index: 0, kind: input, shape index: {}]   ;;  %s1712_s1 = inlined_call_operand.hbm [shape: f32[9,128], index: 1, kind: input, shape index: {}]   ;;  %s1713_s2 = inlined_call_operand.hbm [shape: f32[2,9], index: 2, kind: input, shape index: {}]   ;;  %s1714_s3 = inlined_call_operand.vmem [shape: f32[8,8], index: 3, kind: input, shape index: {}]   ;;  %s1715_s4 = inlined_call_operand.hbm [shape: bf16[8,8], index: 4, kind: input, shape index: {}]   ;;  %s1716_s5 = inlined_call_operand.hbm [shape: bf16[2,8], index: 5, kind: input, shape index: {}]   ;;  %s1717_s6 = inlined_call_operand.hbm [shape: bf16[2,8], index: 6, kind: input, shape index: {}]   ;;  %s1718_s7 = inlined_call_operand.vmem [shape: bf16[8,2], index: 7, kind: input, shape index: {}]   ;;  %s1719_s8 = inlined_call_operand.vmem [shape: f32[8,4], index: 8, kind: input, shape index: {}]   ;;  %s1720_s9 = inlined_call_operand.vmem [shape: f32[2,1], index: 9, kind: input, shape index: {}]   ;;  %s1721_s10 = inlined_call_operand.hbm [shape: f32[2,8,128], index: 10, kind: output, shape index: {}]  }
   0x1   :  { %16 = vsyncpa [#allocation5], 0 }
   0x2   :  { %17 = vsyncpa [#allocation8], 0 }
   0x3   :  { %18 = vsyncpa [#allocation11], 0 }
   0x4   :  { %19 = vsyncpa [#allocation4], 0  ;;  %s1253_s13 = smov [#allocation7]   ;;  %s1254_s15 = smov [#allocation2]  }
   0x5   :  { %s50_s14 = sshll.u32 %s1253_s13, 4  ;;  %s27_s16 = sshll.u32 %s1254_s15, 4  ;;  %s51_s14 = int_to_ptr.vmem [resolvable:$true] %s50_s14  ;;  %s28_s16 = int_to_ptr.vmem [resolvable:$true] %s27_s16 }
   0x6   :  { %s1143_s17 = scalar_lea.vmem %s51_s14, 64  ;;  %p1148_p1 = scmp.lt.s32.totalorder %s51_s14, %s51_s14 }
   0x7   :  { %p1144_p0 = scmp.ne.s32.totalorder %s51_s14, %s1143_s17  ;;  %p1149_p2 = scmp.lt.s32.totalorder %s1143_s17, %s1143_s17 }
   0x9   :  { %p1150_p3 = por %p1149_p2, %p1148_p1 }
   0xb   :  { %p1151_p4 = pnand %p1150_p3, %p1144_p0 }
   0xd   :  { %1154 = shalt.err (!%p1151_p4)
}
   0xe   :  { %53 = dma.hbm_to_vmem [thread:$0]  %s1715_s4, 64, %s51_s14, [#allocation8]  }
   0xf   :  { %s1163_s20 = scalar_lea.vmem %s28_s16, 256  ;;  %p1168_p6 = scmp.lt.s32.totalorder %s28_s16, %s28_s16 }
  0x10   :  { %p1164_p5 = scmp.ne.s32.totalorder %s28_s16, %s1163_s20  ;;  %p1169_p7 = scmp.lt.s32.totalorder %s1163_s20, %s1163_s20 }
  0x12   :  { %p1170_p8 = por %p1169_p7, %p1168_p6 }
  0x14   :  { %p1171_p9 = pnand %p1170_p8, %p1164_p5 }
  0x16   :  { %1174 = shalt.err (!%p1171_p9)
}
  0x17   :  { %s1722_s21 = smov 128   ;;  %s1723_s22 = smov 8  }
  0x18   :  { %33 = dma.hbm_to_vmem [thread:$0]  %s1712_s1, 256, %s28_s16, [#allocation3], %s1722_s21, %s1722_s21, %s1723_s22  }
  0x19   :  { %s1257_s25 = smov [#allocation6]   ;;  %s1258_s4 = smov [#allocation9]  }
  0x1a   :  { %41 = dma.hbm_to_smem %s1713_s2, 32, %s1257_s25, [#allocation5]  }
  0x1b   :  { %s60_s28 = sshll.u32 %s1258_s4, 4  ;;  %s1259_s29 = smov [#allocation10]   ;;  %s61_s28 = int_to_ptr.vmem [resolvable:$true] %s60_s28 }
  0x1c   :  { %s70_s30 = sshll.u32 %s1259_s29, 4  ;;  %s1191_s11 = scalar_lea.vmem %s61_s28, 16  ;;  %s71_s30 = int_to_ptr.vmem [resolvable:$true] %s70_s30 }
  0x1d   :  { %p1192_p10 = scmp.ne.s32.totalorder %s61_s28, %s1191_s11  ;;  %s1195_s12 = scalar_lea.vmem %s61_s28, 32 }
  0x1e   :  { %p1196_p11 = scmp.lt.s32.totalorder %s61_s28, %s61_s28  ;;  %p1197_p12 = scmp.lt.s32.totalorder %s1195_s12, %s1191_s11 }
  0x20   :  { %p1198_p13 = por %p1197_p12, %p1196_p11 }
  0x22   :  { %p1199_p0 = pnand %p1198_p13, %p1192_p10 }
  0x24   :  { %1202 = shalt.err (!%p1199_p0)
}
  0x25   :  { %63 = dma.hbm_to_vmem [thread:$0]  %s1716_s5, 16, %s61_s28, [#allocation8]  }
  0x26   :  { %s1211_s14 = scalar_lea.vmem %s71_s30, 16  ;;  %s1215_s2 = scalar_lea.vmem %s71_s30, 32 }
  0x27   :  { %p1212_p1 = scmp.ne.s32.totalorder %s71_s30, %s1211_s14  ;;  %p1216_p2 = scmp.lt.s32.totalorder %s71_s30, %s71_s30 }
  0x28   :  { %p1217_p3 = scmp.lt.s32.totalorder %s1215_s2, %s1211_s14 }
  0x2a   :  { %p1218_p4 = por %p1217_p3, %p1216_p2 }
  0x2c   :  { %p1219_p5 = pnand %p1218_p4, %p1212_p1 }
  0x2e   :  { %1222 = shalt.err (!%p1219_p5)
}
  0x2f   :  { %73 = dma.hbm_to_vmem [thread:$0]  %s1717_s6, 16, %s71_s30, [#allocation11]  }
  0x30   :  { %1243 = dma.done.wait [#allocation3], 256  }
  0x31   :  { %1244 = vsyncadd [#allocation3], 4294967040 }
  0x32   :  { %1245 = dma.done.wait [#allocation5], 32  }
  0x33   :  { %1246 = vsyncadd [#allocation5], 4294967264 }
  0x34   :  { %1247 = dma.done.wait [#allocation8], 80  }
  0x35   :  { %1248 = vsyncadd [#allocation8], 4294967216 }
  0x36   :  { %1249 = dma.done.wait [#allocation11], 16  }
  0x37   :  { %1250 = vsyncadd [#allocation11], 4294967280 }
  0x38   :  { %95 = sfence }
  0x39   :  { %v1351_v0 = vld [vmem:[%s1711_s0] sm:$0xff]  ;;  %v1260_v6 = vmov 0.0   ;;  %vm1261_vm0 = vmmov 0   ;;  %s1362_s6 = sld [smem:[#allocation6 + $0x1]]  ;;  %s1262_s30 = smov 16   ;;  %vm233_vm1 = vcmask 64512  }
  0x3a   :  { %229 = vadd.xlane.f32.xlu0 %v1351_v0  ;;  %v108_v1 = vrot.slane %v1351_v0, 4  ;;  %1025 = vmatprep.subr.mxu0 %v1260_v6  ;;  %s1364_s18 = sld [smem:[#allocation6 + $0x81]]  ;;  %s1263_s13 = smov 15   ;;  %v1471_v51 = vld [vmem:[%s1714_s3] sm:$0xff]  ;;  %v1481_v52 = vld [vmem:[%s1711_s0 + $0x8] sm:$0xff]  ;;  %v1270_v53 = vmov 0   ;;  %v107_v54 = vpack.c.bf16 %v1351_v0, %v1351_v0 }
  0x3b   :  { %1030 = vmatprep.subr.bf16.mxu1 %v1260_v6  ;;  %1027 = vmatprep.mubr.msk.f32.mxu0 %vm1261_vm0, %v1260_v6  ;;  %s1366_s19 = sld [smem:[#allocation6 + $0x2]]  ;;  %s1264_s2 = smov 17   ;;  %vm332_vm2 = vcmask 1043456   ;;  %v1489_v56 = vld [vmem:[#allocation7] sm:$0xf]  ;;  %v553_v63 = vrot.slane %v1481_v52, 4 }
  0x3c   :  { %v109_v2 = vadd.f32 %v108_v1, %v1351_v0  ;;  %1032 = vmatprep.mubr.msk.bf16.mxu1 %vm1261_vm0, %v1260_v6  ;;  %s1370_s20 = sld [smem:[#allocation6 + $0x82]]  ;;  %s1265_s15 = smov 1   ;;  %1105 = vset.pattern.permute.xlu0 %v1270_v53  ;;  %v334_v55 = vsel %vm332_vm2, %v107_v54, 0  ;;  %vm482_vm3 = vcmask 1040384   ;;  %vm478_vm4 = vcmask 15360  }
  0x3d   :  { %s1372_s23 = sld [smem:[#allocation6 + $0x3]]  ;;  %s1724_s16 = smov 127   ;;  %1106 = vset.pattern.permute.xlu1 %v1270_v53  ;;  %1031 = vmatpush3.bf16.msra.mxu1 %v334_v55  ;;  %v554_v1 = vadd.f32 %v1481_v52, %v553_v63 }
  0x3e   :  { %v110_v3 = vrot.slane %v109_v2, 2  ;;  %s1374_s24 = sld [smem:[#allocation6 + $0x83]]  ;;  %s1726_s5 = smov 113   ;;  %1042 = vmatprep.subr.bf16.mxu1 %v1260_v6 }
  0x3f   :  { %v135_v9 = vstv %s1362_s6  ;;  %s1377_s25 = sld [smem:[#allocation6]]  ;;  %s1725_s17 = smov 112  }
  0x40   :  { %v111_v4 = vadd.f32 %v110_v3, %v109_v2  ;;  %v138_v11 = vstv %s1364_s18  ;;  %s1383_s26 = sld [smem:[#allocation6 + $0x80]]  ;;  %s1269_s21 = smov 111   ;;  %1033 = vmatmul.mubr.msk.bf16.vlgmr.msra.gmra.mxu1 %vm233_vm1, %v1489_v56  ;;  %v555_v2 = vrot.slane %v554_v1, 2 }
  0x41   :  { %v149_v13 = vstv %s1366_s19  ;;  %s1389_s27 = sld [smem:[#allocation6 + $0x5]]  ;;  %1044 = vmatprep.mubr.msk.bf16.mxu1 %vm1261_vm0, %v1260_v6  ;;  %s1727_s6 = smov 127  }
  0x42   :  { %v112_v5 = vrot.slane %v111_v4, 1  ;;  %v152_v15 = vstv %s1370_s20  ;;  %s1395_s4 = sld [smem:[#allocation6 + $0x85]]  ;;  %v556_v3 = vadd.f32 %v555_v2, %v554_v1  ;;  %s1728_s18 = smov 113  }
  0x43   :  { %v162_v18 = vstv %s1372_s23  ;;  %s1401_s28 = sld [smem:[#allocation6 + $0x6]]  ;;  %s1729_s19 = smov 112  }
  0x44   :  { %v113_v7 = vadd.f32 %v112_v5, %v111_v4  ;;  %v165_v19 = vstv %s1374_s24  ;;  %s1404_s29 = sld [smem:[#allocation6 + $0x86]]  ;;  %v557_v5 = vrot.slane %v556_v3, 1 }
  0x45   :  { %v124_v23 = vstv %s1377_s25  ;;  %s1414_s11 = sld [smem:[#allocation6 + $0x7]] }
  0x46   :  { %v1368_v8 = vmul.f32 0.125, %v113_v7  ;;  %v127_v25 = vstv %s1383_s26  ;;  %s1420_s12 = sld [smem:[#allocation6 + $0x87]]  ;;  %v1499_v7 = vld [vmem:[#allocation10] sm:$0x1] }
  0x47   :  { %v175_v27 = vstv %s1389_s27  ;;  %s1434_s1 = sld [smem:[#allocation6 + $0x8]] }
  0x48   :  { %v136_v10 = vmul.f32 %v135_v9, %v1368_v8  ;;  %v139_v12 = vmul.f32 %v138_v11, %v1368_v8  ;;  %v150_v14 = vmul.f32 %v149_v13, %v1368_v8  ;;  %v153_v17 = vmul.f32 %v152_v15, %v1368_v8  ;;  %s1438_s14 = sld [smem:[#allocation6 + $0x88]] }
  0x49   :  { %v163_v21 = vmul.f32 %v162_v18, %v1368_v8  ;;  %v166_v22 = vmul.f32 %v165_v19, %v1368_v8  ;;  %v125_v24 = vmul.f32 %v124_v23, %v1368_v8  ;;  %v128_v26 = vmul.f32 %v127_v25, %v1368_v8  ;;  %s1538_s22 = sld [smem:[#allocation6 + $0x84]] }
  0x4a   :  { %v140_v16 = vadd.f32 %v139_v12, %v136_v10  ;;  %v154_v20 = vadd.f32 %v153_v17, %v150_v14  ;;  %v178_v28 = vstv %s1395_s4  ;;  %v176_v31 = vmul.f32 %v175_v27, %v1368_v8  ;;  %v105_v14 = vld [vmem:[%s1720_s9] sm:$0x3]  ;;  %s1536_s9 = sld [smem:[#allocation6 + $0x4]] }
  0x4b   :  { %v167_v29 = vadd.f32 %v166_v22, %v163_v21  ;;  %v129_v30 = vadd.f32 %v128_v26, %v125_v24  ;;  %v179_v32 = vmul.f32 %v178_v28, %v1368_v8  ;;  %v188_v33 = vstv %s1401_s28 }
  0x4c   :  { %141 = vrot.lane.b32.xlu1 %v140_v16, %s1262_s30  ;;  %v191_v34 = vstv %s1404_s29  ;;  %v189_v36 = vmul.f32 %v188_v33, %v1368_v8  ;;  %v201_v38 = vstv %s1414_s11  ;;  %v204_v39 = vstv %s1420_s12 }
  0x4d   :  { %v180_v35 = vadd.f32 %v179_v32, %v176_v31  ;;  %v192_v37 = vmul.f32 %v191_v34, %v1368_v8  ;;  %v202_v41 = vmul.f32 %v201_v38, %v1368_v8  ;;  %v205_v42 = vmul.f32 %v204_v39, %v1368_v8 }
  0x4e   :  { %v214_v43 = vstv %s1434_s1  ;;  %v217_v44 = vstv %s1438_s14  ;;  %v558_v10 = vadd.f32 %v557_v5, %v556_v3 }
  0x4f   :  { %v193_v40 = vadd.f32 %v192_v37, %v189_v36  ;;  %v206_v45 = vadd.f32 %v205_v42, %v202_v41  ;;  %v215_v46 = vmul.f32 %v214_v43, %v1368_v8  ;;  %v218_v47 = vmul.f32 %v217_v44, %v1368_v8  ;;  %v1569_v41 = vld [vmem:[#allocation2] sm:$0xff] }
  0x50   :  { %155 = vrot.lane.b32.xlu1 %v154_v20, %s1263_s13  ;;  %130 = vrot.lane.b32.xlu0 %v129_v30, %s1264_s2  ;;  %v1505_v12 = vmul.f32 0.125, %v558_v10  ;;  %v117_v32 = vstv %s1536_s9  ;;  %v196_v1 = vrot.slane %v1569_v41, 6  ;;  %v209_v5 = vrot.slane %v1569_v41, 7 }
  0x51   :  { %v219_v48 = vadd.f32 %v218_v47, %v215_v46 }
  0x52   :  { %v569_v16 = vmul.f32 %v1505_v12, %v124_v23  ;;  %v572_v17 = vmul.f32 %v1505_v12, %v127_v25  ;;  %v580_v20 = vmul.f32 %v1505_v12, %v135_v9  ;;  %v583_v21 = vmul.f32 %v1505_v12, %v138_v11 }
  0x53   :  { %v591_v23 = vmul.f32 %v1505_v12, %v149_v13  ;;  %v594_v25 = vmul.f32 %v1505_v12, %v152_v15  ;;  %v602_v11 = vmul.f32 %v1505_v12, %v162_v18  ;;  %v605_v26 = vmul.f32 %v1505_v12, %v165_v19 }
  0x54   :  { %168 = vrot.lane.b32.xlu1 %v167_v29, %s1265_s15  ;;  %v573_v22 = vadd.f32 %v572_v17, %v569_v16  ;;  %v584_v24 = vadd.f32 %v583_v21, %v580_v20  ;;  %v613_v15 = vmul.f32 %v1505_v12, %v175_v27  ;;  %v616_v18 = vmul.f32 %v1505_v12, %v178_v28  ;;  %v1599_v17 = vld [vmem:[#allocation2 + $0x8] sm:$0x1] }
  0x55   :  { %v595_v9 = vadd.f32 %v594_v25, %v591_v23  ;;  %v606_v13 = vadd.f32 %v605_v26, %v602_v11  ;;  %v624_v30 = vmul.f32 %v1505_v12, %v188_v33  ;;  %v627_v31 = vmul.f32 %v1505_v12, %v191_v34 }
  0x56   :  { %v617_v29 = vadd.f32 %v616_v18, %v613_v15  ;;  %v635_v28 = vmul.f32 %v1505_v12, %v201_v38  ;;  %v638_v36 = vmul.f32 %v1505_v12, %v204_v39  ;;  %v649_v38 = vmul.f32 %v1505_v12, %v217_v44 }
  0x57   :  { %v628_v27 = vadd.f32 %v627_v31, %v624_v30  ;;  %v144_v39 = vrot.slane %v1569_v41, 1  ;;  %v312_v18 = vlaneseq }
  0x58   :  { %181 = vrot.lane.b32.xlu1 %v180_v35, %s1724_s16  ;;  %v120_v35 = vstv %s1538_s22  ;;  %v639_v42 = vadd.f32 %v638_v36, %v635_v28 }
  0x59   :  { %v121_v33 = vmul.f32 %v120_v35, %v1368_v8 }
  0x5c   :  { %194 = vrot.lane.b32.xlu1 %v193_v40, %s1726_s5  ;;  %v118_v40 = vmul.f32 %v117_v32, %v1368_v8 }
  0x5e   :  { %v122_v46 = vadd.f32 %v121_v33, %v118_v40 }
  0x60   :  { %207 = vrot.lane.b32.xlu1 %v206_v45, %s1725_s17  ;;  %v646_v45 = vmul.f32 %v1505_v12, %v214_v43 }
  0x62   :  { %v650_v8 = vadd.f32 %v649_v38, %v646_v45 }
  0x64   :  { %220 = vrot.lane.b32.xlu1 %v219_v48, %s1269_s21 }
  0x88   :  { %660 = vadd.xlane.f32.xlu1 %v1481_v52 }
  0x99   :  { %468 = vperm.xlu1 %1106, %v105_v14  }
  0xbe   :  { %v142_v19 = vpop.permute.xlu1 %141 }
  0xc2   :  { %v156_v37 = vpop.permute.xlu1 %155 }
  0xc3   :  { %v230_v49 = vpop.xlane.xlu0 %229 }
  0xc4   :  { %v232_v50 = vmul.f32 0.0078125, %v230_v49  ;;  %v146_v49 = vmul.f32 %v144_v39, %v142_v19  ;;  %v1604_v19 = vshrl.u32 %v312_v18, 7 }
  0xc6   :  { %1026 = vmatpush3.msra.mxu0 %v232_v50  ;;  %v169_v48 = vpop.permute.xlu1 %168  ;;  %v157_v50 = vrot.slane %v1569_v41, 2 }
  0xc7   :  { %1028 = vmatmul.mubr.msk.f32.vlgmr.msra.gmra.mxu0 %vm233_vm1, %v1471_v51  ;;  %1036 = vmatprep.subr.bf16.mxu0 %v1260_v6  ;;  %v131_v34 = vpop.permute.xlu0 %130 }
  0xc8   :  { %1038 = vmatprep.mubr.msk.bf16.mxu0 %vm1261_vm0, %v1260_v6  ;;  %1037 = vmatpush3.bf16.msra.mxu0 %v334_v55  ;;  %v132_v47 = vmul.f32 %v131_v34, %v1569_v41  ;;  %v159_v44 = vmul.f32 %v157_v50, %v156_v37  ;;  %v170_v55 = vrot.slane %v1569_v41, 3 }
  0xc9   :  { %1048 = vmatprep.subr.bf16.mxu0 %v1260_v6 }
  0xca   :  { %v133_v54 = vadd.f32 %v132_v47, %v122_v46  ;;  %v182_v43 = vpop.permute.xlu1 %181 }
  0xcb   :  { %1039 = vmatmul.mubr.msk.bf16.vlgmr.msra.gmra.mxu0 %vm233_vm1, %v1499_v7 }
  0xcc   :  { %1050 = vmatprep.mubr.msk.bf16.mxu0 %vm1261_vm0, %v1260_v6 }
 0x187   :  { %v303_v57 = vpop.f32.mrf.mxu0 }
 0x188   :  { %v307_v58 = vsub.f32 0.0, %v303_v57  ;;  %v147_v57 = vadd.f32 %v146_v49, %v133_v54 }
 0x189   :  { %v1029_v59 = vpop.f32.mrf.mxu0 }
 0x18a   :  { %v308_v60 = vmul.f32 1.442695, %v307_v58  ;;  %v172_v58 = vmul.f32 %v170_v55, %v169_v48  ;;  %v160_v59 = vadd.f32 %v159_v44, %v147_v57 }
 0x18b   :  { %v414_v38 = vpop.f32.mrf.mxu0 }
 0x18c   :  { %1111 = vpow2.f32 %v308_v60  ;;  %v183_v60 = vrot.slane %v1569_v41, 5 }
 0x18d   :  { %v1040_v46 = vpop.f32.mrf.mxu0 }
 0x18e   :  { %v185_v63 = vmul.f32 %v183_v60, %v182_v43 }
 0x18f   :  { %v417_v47 = vpop.f32.mrf.mxu0 }
 0x191   :  { %v1041_v48 = vpop.f32.mrf.mxu0 }
 0x199   :  { %v1112_v61 = vpop.eup %1111 }
 0x19a   :  { %v310_v62 = vadd.f32 1.0, %v1112_v61  ;;  %v195_v61 = vpop.permute.xlu1 %194 }
 0x19c   :  { %1113 = vrcp.f32 %v310_v62  ;;  %v173_v62 = vadd.f32 %v172_v58, %v160_v59 }
 0x19e   :  { %v208_v2 = vpop.permute.xlu1 %207  ;;  %v186_v3 = vadd.f32 %v185_v63, %v173_v62 }
 0x19f   :  { %v211_v14 = vmul.f32 %v209_v5, %v208_v2 }
 0x1a2   :  { %v221_v16 = vpop.permute.xlu1 %220 }
 0x1a3   :  { %v222_v21 = vmul.f32 %v221_v16, %v1599_v17 }
 0x1a6   :  { %v661_v33 = vpop.xlane.xlu1 %660 }
 0x1a7   :  { %v662_v45 = vmul.f32 0.0078125, %v661_v33 }
 0x1a9   :  { %v1114_v4 = vpop.eup %1113 }
 0x1aa   :  { %319 = vperm.xlu0 %1105, %v1114_v4   ;;  %v198_v4 = vmul.f32 %v196_v1, %v195_v61  ;;  %v1636_v54 = vpop.permute.xlu1 %468 }
 0x1ac   :  { %v199_v10 = vadd.f32 %v198_v4, %v186_v3  ;;  %v1643_v4 = vld [vmem:[%s1718_s7] sm:$0xf] }
 0x1ae   :  { %574 = vrot.lane.b32.xlu0 %v573_v22, %s1264_s2  ;;  %v212_v20 = vadd.f32 %v211_v14, %v199_v10  ;;  %v1602_v22 = vpop.f32.mrf.mxu1 }
 0x1b0   :  { %v1034_v23 = vpop.f32.mrf.mxu1 }
 0x1b2   :  { %585 = vrot.lane.b32.xlu0 %v584_v24, %s1262_s30  ;;  %v223_v24 = vadd.f32 %v222_v21, %v212_v20  ;;  %v373_v25 = vpop.f32.mrf.mxu1  ;;  %v1658_v21 = vld [vmem:[%s1719_s8] sm:$0xff]  ;;  %s1274_s8 = smov [#allocation12]  }
 0x1b3   :  { %s945_s24 = sshll.u32 %s1274_s8, 4  ;;  %s946_s24 = int_to_ptr.vmem [resolvable:$true] %s945_s24 }
 0x1b4   :  { %v1035_v11 = vpop.f32.mrf.mxu1  ;;  %s1223_s25 = scalar_lea.vmem %s946_s24, 256  ;;  %p1228_p7 = scmp.lt.s32.totalorder %s946_s24, %s946_s24 }
 0x1b5   :  { %p1224_p6 = scmp.ne.s32.totalorder %s946_s24, %s1223_s25  ;;  %p1229_p8 = scmp.lt.s32.totalorder %s1223_s25, %s1223_s25 }
 0x1b6   :  { %596 = vrot.lane.b32.xlu0 %v595_v9, %s1263_s13  ;;  %v224_v9 = vsub.f32 0.0, %v223_v24  ;;  %v1271_v24 = vmov 1  }
 0x1b7   :  { %p1230_p9 = por %p1229_p8, %p1228_p7 }
 0x1b8   :  { %v225_v26 = vmul.f32 1.442695, %v224_v9  ;;  %v565_v9 = vmul.f32 %v1505_v12, %v120_v35 }
 0x1b9   :  { %p1231_p10 = pnand %p1230_p9, %p1224_p6 }
 0x1ba   :  { %607 = vrot.lane.b32.xlu0 %v606_v13, %s1265_s15  ;;  %1115 = vpow2.f32 %v225_v26 }
 0x1be   :  { %618 = vrot.lane.b32.xlu0 %v617_v29, %s1727_s6  ;;  %v314_v29 = vsub.s32 0, %v1604_v19 }
 0x1c2   :  { %629 = vrot.lane.b32.xlu0 %v628_v27, %s1728_s18 }
 0x1c6   :  { %640 = vrot.lane.b32.xlu0 %v639_v42, %s1729_s19  ;;  %v1616_v42 = vld [vmem:[#allocation9] sm:$0x1] }
 0x1c7   :  { %v1116_v13 = vpop.eup %1115 }
 0x1c8   :  { %v227_v15 = vadd.f32 1.0, %v1116_v13 }
 0x1ca   :  { %651 = vrot.lane.b32.xlu0 %v650_v8, %s1269_s21  ;;  %1117 = vrcp.f32 %v227_v15  ;;  %v552_v8 = vpack.c.bf16 %v1481_v52, %v1481_v52 }
 0x1cc   :  { %v751_v49 = vsel %vm332_vm2, %v552_v8, 0 }
 0x1d7   :  { %v1118_v30 = vpop.eup %1117 }
 0x1d8   :  { %v315_v31 = vrot.slane %v1118_v30, %v314_v29 }
 0x1da   :  { %v316_v28 = vmul.f32 %v315_v31, %v1351_v0 }
 0x225   :  { %v320_v27 = vpop.permute.xlu0 %319 }
 0x226   :  { %v322_v36 = vmul.f32 %v320_v27, %v1351_v0 }
 0x228   :  { %v1611_v37 = vadd.f32 %v322_v36, %v316_v28 }
 0x22a   :  { %v376_v40 = vpack.c.bf16 %v1611_v37, %v1611_v37 }
 0x22c   :  { %v424_v34 = vsel %vm332_vm2, %v376_v40, 0 }
 0x22d   :  { %1043 = vmatpush3.bf16.msra.mxu1 %v424_v34 }
 0x22e   :  { %1054 = vmatprep.subr.mxu1 %v1260_v6 }
 0x230   :  { %1045 = vmatmul.mubr.msk.bf16.vlgmr.msra.gmra.mxu1 %vm233_vm1, %v1616_v42 }
 0x231   :  { %1055 = vmatpush3.msra.mxu1 %v662_v45  ;;  %1056 = vmatprep.mubr.msk.f32.mxu1 %vm1261_vm0, %v1260_v6 }
 0x232   :  { %1065 = vmatprep.subr.bf16.mxu1 %v1260_v6 }
 0x238   :  { %1057 = vmatmul.mubr.msk.f32.vlgmr.msra.gmra.mxu1 %vm233_vm1, %v1471_v51 }
 0x239   :  { %1067 = vmatprep.mubr.msk.bf16.mxu1 %vm1261_vm0, %v1260_v6  ;;  %1066 = vmatpush3.bf16.msra.mxu1 %v751_v49 }
 0x23a   :  { %1077 = vmatprep.subr.bf16.mxu1 %v1260_v6 }
 0x23c   :  { %1068 = vmatmul.mubr.msk.bf16.vlgmr.msra.gmra.mxu1 %vm233_vm1, %v1499_v7 }
 0x23d   :  { %1079 = vmatprep.mubr.msk.bf16.mxu1 %vm1261_vm0, %v1260_v6 }
 0x2f0   :  { %v460_v51 = vpop.f32.mrf.mxu1 }
 0x2f1   :  { %v461_v43 = vadd.f32 %v460_v51, %v414_v38 }
 0x2f2   :  { %v1046_v44 = vpop.f32.mrf.mxu1 }
 0x2f3   :  { %v471_v57 = vadd.f32 %v1636_v54, %v461_v43 }
 0x2f4   :  { %v463_v58 = vpop.f32.mrf.mxu1 }
 0x2f5   :  { %v472_v59 = vmax.f32 %v471_v57, 0.0 }
 0x2f6   :  { %v1047_v61 = vpop.f32.mrf.mxu1 }
 0x2f7   :  { %v473_v62 = vpack.c.bf16 %v472_v59, %v472_v59 }
 0x2f8   :  { %v729_v63 = vpop.f32.mrf.mxu1 }
 0x2f9   :  { %v733_v2 = vsub.f32 0.0, %v729_v63  ;;  %v484_v3 = vsel %vm482_vm3, %v473_v62, 0 }
 0x2fa   :  { %1049 = vmatpush3.bf16.msra.mxu0 %v484_v3  ;;  %v1058_v7 = vpop.f32.mrf.mxu1 }
 0x2fb   :  { %v734_v10 = vmul.f32 1.442695, %v733_v2  ;;  %1059 = vmatprep.subr.bf16.mxu0 %v1260_v6 }
 0x2fc   :  { %v828_v62 = vpop.f32.mrf.mxu1 }
 0x2fd   :  { %1119 = vpow2.f32 %v734_v10  ;;  %1051 = vmatmul.mubr.msk.bf16.vlgmr.msra.gmra.mxu0 %vm478_vm4, %v1643_v4 }
 0x2fe   :  { %1060 = vmatpush3.bf16.msra.mxu0 %v751_v49  ;;  %1061 = vmatprep.mubr.msk.bf16.mxu0 %vm1261_vm0, %v1260_v6  ;;  %v1069_v2 = vpop.f32.mrf.mxu1 }
 0x2ff   :  { %1071 = vmatprep.subr.bf16.mxu0 %v1260_v6 }
 0x300   :  { %v831_v7 = vpop.f32.mrf.mxu1 }
 0x305   :  { %1062 = vmatmul.mubr.msk.bf16.vlgmr.msra.gmra.mxu0 %vm233_vm1, %v1489_v56  ;;  %v575_v56 = vpop.permute.xlu0 %574 }
 0x306   :  { %1073 = vmatprep.mubr.msk.bf16.mxu0 %vm1261_vm0, %v1260_v6  ;;  %v562_v6 = vmul.f32 %v1505_v12, %v117_v32  ;;  %v576_v26 = vmul.f32 %v575_v56, %v1569_v41 }
 0x308   :  { %v566_v11 = vadd.f32 %v565_v9, %v562_v6 }
 0x309   :  { %v586_v23 = vpop.permute.xlu0 %585 }
 0x30a   :  { %v1120_v14 = vpop.eup %1119  ;;  %v577_v15 = vadd.f32 %v576_v26, %v566_v11  ;;  %v587_v18 = vmul.f32 %v586_v23, %v144_v39 }
 0x30b   :  { %v736_v16 = vadd.f32 1.0, %v1120_v14  ;;  %v1070_v14 = vpop.f32.mrf.mxu1 }
 0x30c   :  { %v588_v31 = vadd.f32 %v587_v18, %v577_v15 }
 0x30d   :  { %1121 = vrcp.f32 %v736_v16  ;;  %v597_v25 = vpop.permute.xlu0 %596 }
 0x311   :  { %v608_v13 = vpop.permute.xlu0 %607 }
 0x312   :  { %v609_v32 = vmul.f32 %v608_v13, %v170_v55 }
 0x315   :  { %v619_v30 = vpop.permute.xlu0 %618 }
 0x316   :  { %v620_v12 = vmul.f32 %v619_v30, %v183_v60 }
 0x319   :  { %v630_v28 = vpop.permute.xlu0 %629 }
 0x31a   :  { %v1122_v20 = vpop.eup %1121  ;;  %v631_v33 = vmul.f32 %v630_v28, %v196_v1 }
 0x31b   :  { %745 = vperm.xlu0 %1105, %v1122_v20  }
 0x31d   :  { %v641_v35 = vpop.permute.xlu0 %640 }
 0x31e   :  { %v642_v34 = vmul.f32 %v641_v35, %v209_v5 }
 0x31f   :  { %1107 = vset.pattern.permute.xlu0 %v1271_v24 }
 0x320   :  { %475 = vperm.xlu0 %1107, %v1658_v21  }
 0x321   :  { %v652_v45 = vpop.permute.xlu0 %651 }
 0x322   :  { %v653_v38 = vmul.f32 %v652_v45, %v1599_v17 }
 0x324   :  { %1108 = vset.pattern.permute.xlu0 %v1270_v53  ;;  %v598_v53 = vmul.f32 %v597_v25, %v157_v50 }
 0x326   :  { %v599_v27 = vadd.f32 %v598_v53, %v588_v31 }
 0x328   :  { %v610_v36 = vadd.f32 %v609_v32, %v599_v27  ;;  %v1272_v32 = vmov 2  }
 0x329   :  { %1109 = vset.pattern.permute.xlu1 %v1272_v32 }
 0x32a   :  { %v621_v40 = vadd.f32 %v620_v12, %v610_v36 }
 0x32c   :  { %v632_v39 = vadd.f32 %v631_v33, %v621_v40 }
 0x32e   :  { %v643_v50 = vadd.f32 %v642_v34, %v632_v39 }
 0x330   :  { %v654_v46 = vadd.f32 %v653_v38, %v643_v50 }
 0x332   :  { %v655_v55 = vsub.f32 0.0, %v654_v46 }
 0x334   :  { %v656_v47 = vmul.f32 1.442695, %v655_v55 }
 0x336   :  { %1123 = vpow2.f32 %v656_v47 }
 0x343   :  { %v1124_v48 = vpop.eup %1123 }
 0x344   :  { %v658_v8 = vadd.f32 1.0, %v1124_v48 }
 0x346   :  { %1125 = vrcp.f32 %v658_v8 }
 0x353   :  { %v1126_v60 = vpop.eup %1125 }
 0x354   :  { %v741_v49 = vrot.slane %v1126_v60, %v314_v29 }
 0x356   :  { %v742_v51 = vmul.f32 %v1481_v52, %v741_v49 }
 0x396   :  { %v746_v1 = vpop.permute.xlu0 %745 }
 0x397   :  { %v748_v41 = vmul.f32 %v1481_v52, %v746_v1 }
 0x399   :  { %v1686_v5 = vadd.f32 %v748_v41, %v742_v51 }
 0x39b   :  { %v793_v17 = vpack.c.bf16 %v1686_v5, %v1686_v5  ;;  %v476_v44 = vpop.permute.xlu0 %475 }
 0x39d   :  { %v835_v43 = vsel %vm332_vm2, %v793_v17, 0 }
 0x39e   :  { %1072 = vmatpush3.bf16.msra.mxu0 %v835_v43 }
 0x3a1   :  { %1074 = vmatmul.mubr.msk.bf16.vlgmr.msra.gmra.mxu0 %vm233_vm1, %v1616_v42 }
 0x3bd   :  { %v520_v57 = vpop.f32.mrf.mxu0 }
 0x3be   :  { %v521_v19 = vadd.f32 %v520_v57, %v476_v44 }
 0x3bf   :  { %v1052_v29 = vpop.f32.mrf.mxu0 }
 0x3c0   :  { %526 = vmax.xlane.f32.xlu0 %v521_v19 }
 0x3c1   :  { %v523_v58 = vpop.f32.mrf.mxu0 }
 0x3c3   :  { %v1053_v59 = vpop.f32.mrf.mxu0 }
 0x3c5   :  { %v787_v61 = vpop.f32.mrf.mxu0 }
 0x3c7   :  { %v1063_v63 = vpop.f32.mrf.mxu0 }
 0x3c9   :  { %v790_v3 = vpop.f32.mrf.mxu0 }
 0x3cb   :  { %v1064_v10 = vpop.f32.mrf.mxu0 }
 0x449   :  { %v527_v16 = vpop.xlane.xlu0 %526 }
 0x44a   :  { %v528_v20 = vsub.f32 %v521_v19, %v527_v16 }
 0x44c   :  { %v529_v24 = vmul.f32 1.442695, %v528_v20 }
 0x44e   :  { %1127 = vpow2.f32 %v529_v24 }
 0x45b   :  { %v1128_v42 = vpop.eup %1127 }
 0x45c   :  { %531 = vadd.xlane.f32.xlu0 %v1128_v42 }
 0x461   :  { %v871_v56 = vpop.f32.mrf.mxu0 }
 0x462   :  { %v872_v23 = vadd.f32 %v871_v56, %v828_v62 }
 0x463   :  { %v1075_v25 = vpop.f32.mrf.mxu0 }
 0x464   :  { %v877_v6 = vadd.f32 %v872_v23, %v1636_v54  ;;  %v1273_v54 = vmov 3  }
 0x465   :  { %v874_v9 = vpop.f32.mrf.mxu0 }
 0x466   :  { %v878_v11 = vmax.f32 %v877_v6, 0.0 }
 0x467   :  { %v1076_v26 = vpop.f32.mrf.mxu0 }
 0x468   :  { %v879_v13 = vpack.c.bf16 %v878_v11, %v878_v11 }
 0x46a   :  { %v881_v15 = vsel %vm482_vm3, %v879_v13, 0 }
 0x46b   :  { %1078 = vmatpush3.bf16.msra.mxu1 %v881_v15 }
 0x46e   :  { %1080 = vmatmul.mubr.msk.bf16.vlgmr.msra.gmra.mxu1 %vm478_vm4, %v1643_v4 }
 0x4e5   :  { %v532_v4 = vpop.xlane.xlu0 %531 }
 0x52e   :  { %v917_v18 = vpop.f32.mrf.mxu1 }
 0x52f   :  { %v918_v30 = vadd.f32 %v917_v18, %v476_v44 }
 0x530   :  { %v1081_v31 = vpop.f32.mrf.mxu1 }
 0x531   :  { %923 = vmax.xlane.f32.xlu1 %v918_v30 }
 0x532   :  { %v920_v53 = vpop.f32.mrf.mxu1 }
 0x534   :  { %v1082_v27 = vpop.f32.mrf.mxu1 }
 0x542   :  { %538 = vperm.xlu1 %1109, %v1658_v21  }
 0x546   :  { %1110 = vset.pattern.permute.xlu1 %v1273_v54 }
 0x547   :  { %543 = vperm.xlu1 %1110, %v1658_v21  }
 0x5ba   :  { %v924_v28 = vpop.xlane.xlu1 %923 }
 0x5bb   :  { %v925_v36 = vsub.f32 %v918_v30, %v924_v28 }
 0x5bd   :  { %v926_v12 = vmul.f32 1.442695, %v925_v36 }
 0x5be   :  { %v539_v34 = vpop.permute.xlu1 %538 }
 0x5bf   :  { %1129 = vpow2.f32 %v926_v12 }
 0x5c0   :  { %1131 = vrcp.f32 %v532_v4 }
 0x5c2   :  { %v544_v47 = vpop.permute.xlu1 %543 }
 0x5cc   :  { %v1130_v35 = vpop.eup %1129 }
 0x5cd   :  { %928 = vadd.xlane.f32.xlu0 %v1130_v35  ;;  %v1132_v33 = vpop.eup %1131 }
 0x5ce   :  { %v534_v45 = vmul.f32 %v1132_v33, %v1128_v42 }
 0x5e3   :  { %326 = vperm.xlu0 %1108, %v1658_v21  }
 0x656   :  { %v929_v40 = vpop.xlane.xlu0 %928 }
 0x657   :  { %1133 = vrcp.f32 %v929_v40 }
 0x65e   :  { %v327_v39 = vpop.permute.xlu0 %326 }
 0x65f   :  { %v371_v50 = vadd.f32 %v1602_v22, %v327_v39  ;;  %v788_v8 = vadd.f32 %v787_v61, %v327_v39 }
 0x661   :  { %v535_v38 = vmul.f32 %v534_v45, %v371_v50 }
 0x663   :  { %v536_v46 = vadd.f32 %v535_v38, %v1611_v37 }
 0x664   :  { %v1134_v55 = vpop.eup %1133 }
 0x665   :  { %v931_v48 = vmul.f32 %v1134_v55, %v1130_v35  ;;  %v541_v60 = vmul.f32 %v539_v34, %v536_v46 }
 0x667   :  { %v932_v49 = vmul.f32 %v931_v48, %v788_v8  ;;  %v546_v21 = vadd.f32 %v544_v47, %v541_v60 }
 0x669   :  { %v933_v1 = vadd.f32 %v932_v49, %v1686_v5  ;;  %v547_v51 = vadd.f32 %v546_v21, %v1351_v0 }
 0x66b   :  { %v934_v41 = vmul.f32 %v933_v1, %v539_v34  ;;  %v548_v17 = vmax.f32 %v547_v51, 0.0 }
 0x66d   :  { %v935_v43 = vadd.f32 %v934_v41, %v544_v47  ;;  %549 = vst [vmem:[#allocation12] sm:$0xff] %v548_v17 }
 0x66f   :  { %v936_v22 = vadd.f32 %v1481_v52, %v935_v43 }
 0x671   :  { %v937_v37 = vmax.f32 %v936_v22, 0.0 }
 0x673   :  { %939 = vst [vmem:[#allocation12 + $0x8] sm:$0xff] %v937_v37 }
 0x674   :  { %1234 = shalt.err (!%p1231_p10)
}
 0x675   :  { %s1730_s26 = smov 8   ;;  %s1731_s27 = smov 128  }
 0x676   :  { %951 = dma.vmem_to_hbm [thread:$0]  %s946_s24, 256, %s1721_s10, [#allocation4], %s1731_s27, %s1731_s27, %s1730_s26  }
 0x677   :  { %1251 = dma.done.wait [#allocation4], 256  }
 0x678   :  { %1252 = vsyncadd [#allocation4], 4294967040 }
 0x679   :  { %955 = vsyncpa [#allocation3], 1 }
 0x67a   :  { %956 = vsyncpa [#allocation8], 1 }
 0x67b   :  { %957 = vsyncpa [#allocation11], 1 }
 0x67c   :  { %958 = vsyncpa [#allocation4], 1 }
 0x67d   :  { %959 = vsyncpa [#allocation5], 1 }

</bundles_post_ra>
